<compile_context>
chip_gen: v5e
topology: v5e:2x2
jax: 0.10.0
libtpu: 0.0.40
codegen_flags: <defaults>
</compile_context>

<pallas_src>
import math

import jax
import jax.numpy as jnp
from jax.experimental import pallas as pl
from jax.experimental.pallas import tpu as pltpu


# Cap on (timesteps * batch) rows handled per chunk.  Keeps the
# double-buffered embedded block + the single-buffered gi scratch well under
# the smallest scoped-VMEM budget (v7x: 64 MiB physical / ~32 MiB scoped)
# even at production hidden sizes.  Tunable.
_MAX_CHUNK_ROWS = 512


def _make_gru_kernel(total_steps, chunk_steps, batch, hp, needs_mask):
    """Builds the chunked GRU kernel with static config closed over."""

    def kernel(emb_ref, wih_ref, whh_ref, bgi_ref, bhn_ref, h_out_ref,
               h_carry, gi_buf):
        # emb_ref : (TS*B, E)    bf16 embedded rows for this chunk
        # wih_ref : (E, 3Hp)     bf16 W_ih^T, gate-padded (r|z|n)
        # whh_ref : (Hp, 3Hp)    bf16 W_hh^T, gate-padded, zero rows >= H
        # bgi_ref : (1, 3Hp)     f32  b_ih + (r,z blocks of b_hh) folded
        # bhn_ref : (1, Hp)      f32  n-gate block of b_hh
        # h_out   : (1, B, Hp)   f32  final hidden state
        # h_carry : (B, Hp)      f32  hidden state carried across chunks
        # gi_buf  : (TS*B, 3Hp)  f32  per-chunk input projection
        chunk = pl.program_id(0)

        @pl.when(chunk == 0)
        def _():
            h_carry[...] = jnp.zeros_like(h_carry)

        # Per-chunk input projection: ONE bf16 MXU matmul, off the per-step
        # serial path; the result lives only in VMEM (no HBM round trip).
        gi = jnp.dot(emb_ref[...], wih_ref[...],
                     preferred_element_type=jnp.float32)         # (TS*B, 3Hp)
        gi_buf[...] = gi + bgi_ref[...]                          # bias folded in

        whh = whh_ref[...]                                       # bf16, in VMEM
        # Hoist the b_hn broadcast out of the time loop (no CSE inside loops).
        bhn = jnp.broadcast_to(bhn_ref[...], (batch, hp))        # (B, Hp) f32

        if needs_mask:
            valid = jnp.minimum(chunk_steps,
                                total_steps - chunk * chunk_steps)

        def step(t, h):
            gi_t = gi_buf[pl.ds(t * batch, batch), :]            # (B, 3Hp) f32
            # bf16 operands, f32 accumulation; the only matmul on the serial
            # per-step path.
            gh = jnp.dot(h.astype(jnp.bfloat16), whh,
                         preferred_element_type=jnp.float32)     # (B, 3Hp) f32
            # Fused r|z sigmoid over the contiguous, lane-aligned 2Hp slice.
            rz = jax.nn.sigmoid(gi_t[:, :2 * hp] + gh[:, :2 * hp])
            r = rz[:, :hp]
            z = rz[:, hp:]
            n = jnp.tanh(gi_t[:, 2 * hp:] + r * (gh[:, 2 * hp:] + bhn))
            h_new = n + z * (h - n)                              # == (1-z)*n + z*h
            if needs_mask:
                h_new = jnp.where(t < valid, h_new, h)
            return h_new

        h = h_carry[...]
        if chunk_steps <= 32:
            # Fully unrolled static loop: static gi slices, max LLO visibility.
            for t in range(chunk_steps):
                h = step(t, h)
        else:
            # unroll=8: lets the scheduler hoist future gi loads / EUP pushes
            # under the current step's MXU latency (per v6e sweep suggestion).
            h = jax.lax.fori_loop(0, chunk_steps, step, h, unroll=8)
        h_carry[...] = h

        @pl.when(chunk == pl.num_programs(0) - 1)
        def _():
            h_out_ref[0] = h.astype(h_out_ref.dtype)

    return kernel


def _pad_gate_cols(w, hid_dim, hp):
    """(..., 3*H) -> (..., 3*Hp): each gate block (r,z,n) zero-padded to Hp."""
    if hp == hid_dim:
        return w
    pad = [(0, 0)] * (w.ndim - 1) + [(0, hp - hid_dim)]
    parts = [jnp.pad(w[..., g * hid_dim:(g + 1) * hid_dim], pad) for g in range(3)]
    return jnp.concatenate(parts, axis=-1)


@jax.jit
def encoder_forward(src, embedding, w_ih_t, w_hh_t, b_ih, b_hh):
    """src: (seq_len, batch) int32 -> hidden (1, batch, hid_dim) float32."""
    seq_len, batch = src.shape
    hid_dim = w_hh_t.shape[0]
    emb_dim = embedding.shape[1]
    hp = ((hid_dim + 127) // 128) * 128    # per-gate lane-aligned width

    if seq_len == 0:   # nn.GRU would return the zero initial hidden state
        return jnp.zeros((1, batch, hid_dim), jnp.float32)

    # Glue: embedding lookup + (eval-mode) dropout identity.  bf16 halves the
    # HBM traffic of the one tensor the kernel streams.
    embedded = jnp.take(embedding, src, axis=0).astype(jnp.bfloat16)  # (S,B,E)

    # Gate-aligned, zero-padded parameters; weights in bf16 for native MXU
    # matmuls (f32 accumulation inside the kernel).  Padded rows of W_hh stay
    # zero so padded hidden lanes remain exactly 0 through the recurrence.
    w_ih_p = _pad_gate_cols(w_ih_t, hid_dim, hp).astype(jnp.bfloat16)     # (E,3Hp)
    w_hh_p = _pad_gate_cols(w_hh_t, hid_dim, hp)
    w_hh_p = jnp.pad(w_hh_p,
                     ((0, hp - hid_dim), (0, 0))).astype(jnp.bfloat16)    # (Hp,3Hp)
    b_ih_p = _pad_gate_cols(b_ih, hid_dim, hp)                            # (1,3Hp)
    b_hh_p = _pad_gate_cols(b_hh, hid_dim, hp)                            # (1,3Hp)
    # Fold r/z blocks of b_hh into the gi bias (outside the r* multiply);
    # only b_hn must be applied inside the recurrence.
    bias_gi = jnp.concatenate(
        [b_ih_p[:, :2 * hp] + b_hh_p[:, :2 * hp], b_ih_p[:, 2 * hp:]], axis=1)
    b_hn = b_hh_p[:, 2 * hp:]                                             # (1,Hp)

    # Time-chunking: the h carry lives in VMEM scratch across chunks; chunk
    # i+1's embedded DMA overlaps chunk i's recurrence.
    if seq_len * batch <= _MAX_CHUNK_ROWS:
        chunk_steps = seq_len
    else:
        chunk_steps = max(1, _MAX_CHUNK_ROWS // batch)
        while (chunk_steps * batch) % 8 != 0:   # (8,128) BlockSpec tiling
            chunk_steps += 1
    num_chunks = math.ceil(seq_len / chunk_steps)
    rows_chunk = chunk_steps * batch
    rows_total = num_chunks * rows_chunk
    needs_mask = num_chunks * chunk_steps != seq_len

    emb2d = embedded.reshape(seq_len * batch, emb_dim)
    if rows_total != seq_len * batch:
        emb2d = jnp.pad(emb2d, ((0, rows_total - seq_len * batch), (0, 0)))

    kernel = _make_gru_kernel(total_steps=seq_len, chunk_steps=chunk_steps,
                              batch=batch, hp=hp, needs_mask=needs_mask)

    grid_spec = pltpu.PrefetchScalarGridSpec(
        num_scalar_prefetch=0,
        grid=(num_chunks,),
        in_specs=[
            # Streamed per chunk (double-buffered -> DMA/compute overlap).
            pl.BlockSpec((rows_chunk, emb_dim), lambda i: (i, 0)),
            # Constant index maps: fetched once, VMEM-resident across chunks.
            pl.BlockSpec((emb_dim, 3 * hp), lambda i: (0, 0)),
            pl.BlockSpec((hp, 3 * hp), lambda i: (0, 0)),
            pl.BlockSpec((1, 3 * hp), lambda i: (0, 0)),
            pl.BlockSpec((1, hp), lambda i: (0, 0)),
        ],
        out_specs=pl.BlockSpec((1, batch, hp), lambda i: (0, 0, 0)),
        scratch_shapes=[
            pltpu.VMEM((batch, hp), jnp.float32),            # h carry
            pltpu.VMEM((rows_chunk, 3 * hp), jnp.float32),   # per-chunk gi
        ],
    )

    hidden_p = pl.pallas_call(
        kernel,
        out_shape=jax.ShapeDtypeStruct((1, batch, hp), jnp.float32),
        grid_spec=grid_spec,
        compiler_params=pltpu.CompilerParams(
            dimension_semantics=("arbitrary",)),   # sequential recurrence
    )(emb2d, w_ih_p, w_hh_p, bias_gi, b_hn)

    return hidden_p[:, :, :hid_dim]


def encoder_reference(src, embedding, w_ih_t, w_hh_t, b_ih, b_hh):
    """Pure-JAX f32 reference of the same GRU for validation."""
    embedded = jnp.take(embedding, src, axis=0)  # (S, B, E)
    batch = src.shape[1]
    hid = w_hh_t.shape[0]

    def step(h, x):
        gi = x @ w_ih_t + b_ih[0]
        gh = h @ w_hh_t + b_hh[0]
        i_r, i_z, i_n = gi[:, :hid], gi[:, hid:2 * hid], gi[:, 2 * hid:]
        h_r, h_z, h_n = gh[:, :hid], gh[:, hid:2 * hid], gh[:, 2 * hid:]
        r = jax.nn.sigmoid(i_r + h_r)
        z = jax.nn.sigmoid(i_z + h_z)
        n = jnp.tanh(i_n + r * h_n)
        h_new = (1.0 - z) * n + z * h
        return h_new, None

    h0 = jnp.zeros((batch, hid), jnp.float32)
    h_final, _ = jax.lax.scan(step, h0, embedded)
    return h_final[None]  # (1, B, H)


if __name__ == "__main__":
    # Module hyperparameters (small, consistent with Encoder.__init__).
    input_dim = 50   # vocab size
    emb_dim = 32
    hid_dim = 32
    seq_len = 8
    batch = 2

    key = jax.random.PRNGKey(0)
    k_emb, k_wih, k_whh, k_bih, k_bhh, k_src = jax.random.split(key, 6)

    # Deterministic parameter init (shapes per nn.Embedding / nn.GRU).
    embedding = jax.random.normal(k_emb, (input_dim, emb_dim), jnp.float32)
    bound = 1.0 / jnp.sqrt(hid_dim)
    # Stored pre-transposed: (emb, 3*hid) and (hid, 3*hid), gate order r,z,n.
    w_ih_t = jax.random.uniform(k_wih, (emb_dim, 3 * hid_dim), jnp.float32,
                                -bound, bound)
    w_hh_t = jax.random.uniform(k_whh, (hid_dim, 3 * hid_dim), jnp.float32,
                                -bound, bound)
    b_ih = jax.random.uniform(k_bih, (1, 3 * hid_dim), jnp.float32, -bound, bound)
    b_hh = jax.random.uniform(k_bhh, (1, 3 * hid_dim), jnp.float32, -bound, bound)

    src = jax.random.randint(k_src, (seq_len, batch), 0, input_dim, jnp.int32)

    hidden = encoder_forward(src, embedding, w_ih_t, w_hh_t, b_ih, b_hh)
    hidden = jax.block_until_ready(hidden)

    ref = encoder_reference(src, embedding, w_ih_t, w_hh_t, b_ih, b_hh)
    assert hidden.shape == (1, batch, hid_dim), hidden.shape
    # bf16 MXU operands (f32 accumulation) vs an f32 reference: loosen tol.
    assert jnp.allclose(hidden, ref, atol=5e-2, rtol=5e-2), (
        float(jnp.max(jnp.abs(hidden - ref))))

    print("KERNEL_OK")
</pallas_src>

<mosaic_0001>
module attributes {stable_mosaic.version = 11 : i64} {
  func.func @kernel(%arg0: i32, %arg1: memref<16x32xbf16, #tpu.memory_space<vmem>>, %arg2: memref<32x384xbf16, #tpu.memory_space<vmem>>, %arg3: memref<128x384xbf16, #tpu.memory_space<vmem>>, %arg4: memref<1x384xf32, #tpu.memory_space<vmem>>, %arg5: memref<1x128xf32, #tpu.memory_space<vmem>>, %arg6: memref<1x2x128xf32, #tpu.memory_space<vmem>>, %arg7: memref<2x128xf32, #tpu.memory_space<vmem>>, %arg8: memref<16x384xf32, #tpu.memory_space<vmem>>) attributes {dimension_semantics = [#tpu.dimension_semantics<arbitrary>], iteration_bounds = array<i64: 1>, scalar_prefetch = 0 : i64, scratch_operands = 2 : i64, tpu.core_type = #tpu.core_type<tc>, window_params = [{transform_indices = @transform_0, window_bounds = array<i64: 16, 32>}, {pipeline_mode = #tpu.pipeline_mode<synchronous>, transform_indices = @transform_1, window_bounds = array<i64: 32, 384>}, {pipeline_mode = #tpu.pipeline_mode<synchronous>, transform_indices = @transform_2, window_bounds = array<i64: 128, 384>}, {pipeline_mode = #tpu.pipeline_mode<synchronous>, transform_indices = @transform_3, window_bounds = array<i64: 1, 384>}, {pipeline_mode = #tpu.pipeline_mode<synchronous>, transform_indices = @transform_4, window_bounds = array<i64: 1, 128>}, {pipeline_mode = #tpu.pipeline_mode<synchronous>, transform_indices = @transform_5, window_bounds = array<i64: 1, 2, 128>}]} {
    %c0_i32 = arith.constant 0 : i32
    %0 = arith.cmpi eq, %arg0, %c0_i32 : i32
    %1 = arith.extui %0 : i1 to i32
    %c0_i32_0 = arith.constant 0 : i32
    %2 = arith.cmpi ne, %1, %c0_i32_0 : i32
    scf.if %2 {
      %cst_43 = arith.constant 0.000000e+00 : f32
      %195 = vector.broadcast %cst_43 : f32 to vector<2x128xf32>
      %c0_44 = arith.constant 0 : index
      %c0_45 = arith.constant 0 : index
      %196 = vector.load %arg7[%c0_44, %c0_45] : memref<2x128xf32, #tpu.memory_space<vmem>>, vector<2x128xf32>
      tpu.vector_store %arg7[%c0_44, %c0_45], %195 {strides = array<i32>} : memref<2x128xf32, #tpu.memory_space<vmem>>, vector<2x128xf32>,
    } else {
    }
    %c0 = arith.constant 0 : index
    %c0_1 = arith.constant 0 : index
    %3 = vector.load %arg1[%c0, %c0_1] : memref<16x32xbf16, #tpu.memory_space<vmem>>, vector<16x32xbf16>
    %c0_2 = arith.constant 0 : index
    %c0_3 = arith.constant 0 : index
    %4 = vector.load %arg2[%c0_2, %c0_3] : memref<32x384xbf16, #tpu.memory_space<vmem>>, vector<32x384xbf16>
    %cst = arith.constant dense<0.000000e+00> : vector<16x384xf32>
    %5 = tpu.matmul %3, %4, %cst {dimension_numbers = #tpu.dot_dimension_numbers<[1], [0], [0], [1], [0, 0, 1, 1], [], []>} : vector<16x32xbf16>, vector<32x384xbf16>, vector<16x384xf32> -> vector<16x384xf32>
    %c0_4 = arith.constant 0 : index
    %c0_5 = arith.constant 0 : index
    %6 = vector.load %arg4[%c0_4, %c0_5] : memref<1x384xf32, #tpu.memory_space<vmem>>, vector<1x384xf32>
    %7 = vector.broadcast %6 : vector<1x384xf32> to vector<16x384xf32>
    %8 = arith.addf %5, %7 : vector<16x384xf32>
    %c0_6 = arith.constant 0 : index
    %c0_7 = arith.constant 0 : index
    %9 = vector.load %arg8[%c0_6, %c0_7] : memref<16x384xf32, #tpu.memory_space<vmem>>, vector<16x384xf32>
    tpu.vector_store %arg8[%c0_6, %c0_7], %8 {strides = array<i32>} : memref<16x384xf32, #tpu.memory_space<vmem>>, vector<16x384xf32>,
    %c0_8 = arith.constant 0 : index
    %c0_9 = arith.constant 0 : index
    %10 = vector.load %arg3[%c0_8, %c0_9] : memref<128x384xbf16, #tpu.memory_space<vmem>>, vector<128x384xbf16>
    %c0_10 = arith.constant 0 : index
    %c0_11 = arith.constant 0 : index
    %11 = vector.load %arg5[%c0_10, %c0_11] : memref<1x128xf32, #tpu.memory_space<vmem>>, vector<1x128xf32>
    %12 = vector.shape_cast %11 : vector<1x128xf32> to vector<1x128xf32>
    %13 = vector.broadcast %12 : vector<1x128xf32> to vector<2x128xf32>
    %c0_12 = arith.constant 0 : index
    %c0_13 = arith.constant 0 : index
    %14 = vector.load %arg7[%c0_12, %c0_13] : memref<2x128xf32, #tpu.memory_space<vmem>>, vector<2x128xf32>
    %c0_14 = arith.constant 0 : index
    %c0_15 = arith.constant 0 : index
    %15 = vector.load %arg8[%c0_14, %c0_15] : memref<16x384xf32, #tpu.memory_space<vmem>>, vector<2x384xf32>
    %16 = arith.truncf %14 : vector<2x128xf32> to vector<2x128xbf16>
    %cst_16 = arith.constant dense<0.000000e+00> : vector<2x384xf32>
    %17 = tpu.matmul %16, %10, %cst_16 {dimension_numbers = #tpu.dot_dimension_numbers<[1], [0], [0], [1], [0, 0, 1, 1], [], []>} : vector<2x128xbf16>, vector<128x384xbf16>, vector<2x384xf32> -> vector<2x384xf32>
    %18 = vector.extract_strided_slice %15 {offsets = [0, 0], sizes = [2, 256], strides = [1, 1]} : vector<2x384xf32> to vector<2x256xf32>
    %19 = vector.extract_strided_slice %17 {offsets = [0, 0], sizes = [2, 256], strides = [1, 1]} : vector<2x384xf32> to vector<2x256xf32>
    %20 = arith.addf %18, %19 : vector<2x256xf32>
    %21 = arith.negf %20 : vector<2x256xf32>
    %22 = math.exp %21 : vector<2x256xf32>
    %cst_17 = arith.constant 1.000000e+00 : f32
    %23 = vector.broadcast %cst_17 : f32 to vector<2x256xf32>
    %24 = arith.addf %23, %22 : vector<2x256xf32>
    %25 = arith.divf %23, %24 : vector<2x256xf32>
    %26 = vector.extract_strided_slice %25 {offsets = [0, 0], sizes = [2, 128], strides = [1, 1]} : vector<2x256xf32> to vector<2x128xf32>
    %27 = vector.extract_strided_slice %25 {offsets = [0, 128], sizes = [2, 128], strides = [1, 1]} : vector<2x256xf32> to vector<2x128xf32>
    %28 = vector.extract_strided_slice %15 {offsets = [0, 256], sizes = [2, 128], strides = [1, 1]} : vector<2x384xf32> to vector<2x128xf32>
    %29 = vector.extract_strided_slice %17 {offsets = [0, 256], sizes = [2, 128], strides = [1, 1]} : vector<2x384xf32> to vector<2x128xf32>
    %30 = arith.addf %29, %13 : vector<2x128xf32>
    %31 = arith.mulf %26, %30 : vector<2x128xf32>
    %32 = arith.addf %28, %31 : vector<2x128xf32>
    %33 = math.tanh %32 : vector<2x128xf32>
    %34 = arith.subf %14, %33 : vector<2x128xf32>
    %35 = arith.mulf %27, %34 : vector<2x128xf32>
    %36 = arith.addf %33, %35 : vector<2x128xf32>
    %c2 = arith.constant 2 : index
    %c0_18 = arith.constant 0 : index
    %37 = vector.load %arg8[%c2, %c0_18] : memref<16x384xf32, #tpu.memory_space<vmem>>, vector<2x384xf32>
    %38 = arith.truncf %36 : vector<2x128xf32> to vector<2x128xbf16>
    %cst_19 = arith.constant dense<0.000000e+00> : vector<2x384xf32>
    %39 = tpu.matmul %38, %10, %cst_19 {dimension_numbers = #tpu.dot_dimension_numbers<[1], [0], [0], [1], [0, 0, 1, 1], [], []>} : vector<2x128xbf16>, vector<128x384xbf16>, vector<2x384xf32> -> vector<2x384xf32>
    %40 = vector.extract_strided_slice %37 {offsets = [0, 0], sizes = [2, 256], strides = [1, 1]} : vector<2x384xf32> to vector<2x256xf32>
    %41 = vector.extract_strided_slice %39 {offsets = [0, 0], sizes = [2, 256], strides = [1, 1]} : vector<2x384xf32> to vector<2x256xf32>
    %42 = arith.addf %40, %41 : vector<2x256xf32>
    %43 = arith.negf %42 : vector<2x256xf32>
    %44 = math.exp %43 : vector<2x256xf32>
    %cst_20 = arith.constant 1.000000e+00 : f32
    %45 = vector.broadcast %cst_20 : f32 to vector<2x256xf32>
    %46 = arith.addf %45, %44 : vector<2x256xf32>
    %47 = arith.divf %45, %46 : vector<2x256xf32>
    %48 = vector.extract_strided_slice %47 {offsets = [0, 0], sizes = [2, 128], strides = [1, 1]} : vector<2x256xf32> to vector<2x128xf32>
    %49 = vector.extract_strided_slice %47 {offsets = [0, 128], sizes = [2, 128], strides = [1, 1]} : vector<2x256xf32> to vector<2x128xf32>
    %50 = vector.extract_strided_slice %37 {offsets = [0, 256], sizes = [2, 128], strides = [1, 1]} : vector<2x384xf32> to vector<2x128xf32>
    %51 = vector.extract_strided_slice %39 {offsets = [0, 256], sizes = [2, 128], strides = [1, 1]} : vector<2x384xf32> to vector<2x128xf32>
    %52 = arith.addf %51, %13 : vector<2x128xf32>
    %53 = arith.mulf %48, %52 : vector<2x128xf32>
    %54 = arith.addf %50, %53 : vector<2x128xf32>
    %55 = math.tanh %54 : vector<2x128xf32>
    %56 = arith.subf %36, %55 : vector<2x128xf32>
    %57 = arith.mulf %49, %56 : vector<2x128xf32>
    %58 = arith.addf %55, %57 : vector<2x128xf32>
    %c4 = arith.constant 4 : index
    %c0_21 = arith.constant 0 : index
    %59 = vector.load %arg8[%c4, %c0_21] : memref<16x384xf32, #tpu.memory_space<vmem>>, vector<2x384xf32>
    %60 = arith.truncf %58 : vector<2x128xf32> to vector<2x128xbf16>
    %cst_22 = arith.constant dense<0.000000e+00> : vector<2x384xf32>
    %61 = tpu.matmul %60, %10, %cst_22 {dimension_numbers = #tpu.dot_dimension_numbers<[1], [0], [0], [1], [0, 0, 1, 1], [], []>} : vector<2x128xbf16>, vector<128x384xbf16>, vector<2x384xf32> -> vector<2x384xf32>
    %62 = vector.extract_strided_slice %59 {offsets = [0, 0], sizes = [2, 256], strides = [1, 1]} : vector<2x384xf32> to vector<2x256xf32>
    %63 = vector.extract_strided_slice %61 {offsets = [0, 0], sizes = [2, 256], strides = [1, 1]} : vector<2x384xf32> to vector<2x256xf32>
    %64 = arith.addf %62, %63 : vector<2x256xf32>
    %65 = arith.negf %64 : vector<2x256xf32>
    %66 = math.exp %65 : vector<2x256xf32>
    %cst_23 = arith.constant 1.000000e+00 : f32
    %67 = vector.broadcast %cst_23 : f32 to vector<2x256xf32>
    %68 = arith.addf %67, %66 : vector<2x256xf32>
    %69 = arith.divf %67, %68 : vector<2x256xf32>
    %70 = vector.extract_strided_slice %69 {offsets = [0, 0], sizes = [2, 128], strides = [1, 1]} : vector<2x256xf32> to vector<2x128xf32>
    %71 = vector.extract_strided_slice %69 {offsets = [0, 128], sizes = [2, 128], strides = [1, 1]} : vector<2x256xf32> to vector<2x128xf32>
    %72 = vector.extract_strided_slice %59 {offsets = [0, 256], sizes = [2, 128], strides = [1, 1]} : vector<2x384xf32> to vector<2x128xf32>
    %73 = vector.extract_strided_slice %61 {offsets = [0, 256], sizes = [2, 128], strides = [1, 1]} : vector<2x384xf32> to vector<2x128xf32>
    %74 = arith.addf %73, %13 : vector<2x128xf32>
    %75 = arith.mulf %70, %74 : vector<2x128xf32>
    %76 = arith.addf %72, %75 : vector<2x128xf32>
    %77 = math.tanh %76 : vector<2x128xf32>
    %78 = arith.subf %58, %77 : vector<2x128xf32>
    %79 = arith.mulf %71, %78 : vector<2x128xf32>
    %80 = arith.addf %77, %79 : vector<2x128xf32>
    %c6 = arith.constant 6 : index
    %c0_24 = arith.constant 0 : index
    %81 = vector.load %arg8[%c6, %c0_24] : memref<16x384xf32, #tpu.memory_space<vmem>>, vector<2x384xf32>
    %82 = arith.truncf %80 : vector<2x128xf32> to vector<2x128xbf16>
    %cst_25 = arith.constant dense<0.000000e+00> : vector<2x384xf32>
    %83 = tpu.matmul %82, %10, %cst_25 {dimension_numbers = #tpu.dot_dimension_numbers<[1], [0], [0], [1], [0, 0, 1, 1], [], []>} : vector<2x128xbf16>, vector<128x384xbf16>, vector<2x384xf32> -> vector<2x384xf32>
    %84 = vector.extract_strided_slice %81 {offsets = [0, 0], sizes = [2, 256], strides = [1, 1]} : vector<2x384xf32> to vector<2x256xf32>
    %85 = vector.extract_strided_slice %83 {offsets = [0, 0], sizes = [2, 256], strides = [1, 1]} : vector<2x384xf32> to vector<2x256xf32>
    %86 = arith.addf %84, %85 : vector<2x256xf32>
    %87 = arith.negf %86 : vector<2x256xf32>
    %88 = math.exp %87 : vector<2x256xf32>
    %cst_26 = arith.constant 1.000000e+00 : f32
    %89 = vector.broadcast %cst_26 : f32 to vector<2x256xf32>
    %90 = arith.addf %89, %88 : vector<2x256xf32>
    %91 = arith.divf %89, %90 : vector<2x256xf32>
    %92 = vector.extract_strided_slice %91 {offsets = [0, 0], sizes = [2, 128], strides = [1, 1]} : vector<2x256xf32> to vector<2x128xf32>
    %93 = vector.extract_strided_slice %91 {offsets = [0, 128], sizes = [2, 128], strides = [1, 1]} : vector<2x256xf32> to vector<2x128xf32>
    %94 = vector.extract_strided_slice %81 {offsets = [0, 256], sizes = [2, 128], strides = [1, 1]} : vector<2x384xf32> to vector<2x128xf32>
    %95 = vector.extract_strided_slice %83 {offsets = [0, 256], sizes = [2, 128], strides = [1, 1]} : vector<2x384xf32> to vector<2x128xf32>
    %96 = arith.addf %95, %13 : vector<2x128xf32>
    %97 = arith.mulf %92, %96 : vector<2x128xf32>
    %98 = arith.addf %94, %97 : vector<2x128xf32>
    %99 = math.tanh %98 : vector<2x128xf32>
    %100 = arith.subf %80, %99 : vector<2x128xf32>
    %101 = arith.mulf %93, %100 : vector<2x128xf32>
    %102 = arith.addf %99, %101 : vector<2x128xf32>
    %c8 = arith.constant 8 : index
    %c0_27 = arith.constant 0 : index
    %103 = vector.load %arg8[%c8, %c0_27] : memref<16x384xf32, #tpu.memory_space<vmem>>, vector<2x384xf32>
    %104 = arith.truncf %102 : vector<2x128xf32> to vector<2x128xbf16>
    %cst_28 = arith.constant dense<0.000000e+00> : vector<2x384xf32>
    %105 = tpu.matmul %104, %10, %cst_28 {dimension_numbers = #tpu.dot_dimension_numbers<[1], [0], [0], [1], [0, 0, 1, 1], [], []>} : vector<2x128xbf16>, vector<128x384xbf16>, vector<2x384xf32> -> vector<2x384xf32>
    %106 = vector.extract_strided_slice %103 {offsets = [0, 0], sizes = [2, 256], strides = [1, 1]} : vector<2x384xf32> to vector<2x256xf32>
    %107 = vector.extract_strided_slice %105 {offsets = [0, 0], sizes = [2, 256], strides = [1, 1]} : vector<2x384xf32> to vector<2x256xf32>
    %108 = arith.addf %106, %107 : vector<2x256xf32>
    %109 = arith.negf %108 : vector<2x256xf32>
    %110 = math.exp %109 : vector<2x256xf32>
    %cst_29 = arith.constant 1.000000e+00 : f32
    %111 = vector.broadcast %cst_29 : f32 to vector<2x256xf32>
    %112 = arith.addf %111, %110 : vector<2x256xf32>
    %113 = arith.divf %111, %112 : vector<2x256xf32>
    %114 = vector.extract_strided_slice %113 {offsets = [0, 0], sizes = [2, 128], strides = [1, 1]} : vector<2x256xf32> to vector<2x128xf32>
    %115 = vector.extract_strided_slice %113 {offsets = [0, 128], sizes = [2, 128], strides = [1, 1]} : vector<2x256xf32> to vector<2x128xf32>
    %116 = vector.extract_strided_slice %103 {offsets = [0, 256], sizes = [2, 128], strides = [1, 1]} : vector<2x384xf32> to vector<2x128xf32>
    %117 = vector.extract_strided_slice %105 {offsets = [0, 256], sizes = [2, 128], strides = [1, 1]} : vector<2x384xf32> to vector<2x128xf32>
    %118 = arith.addf %117, %13 : vector<2x128xf32>
    %119 = arith.mulf %114, %118 : vector<2x128xf32>
    %120 = arith.addf %116, %119 : vector<2x128xf32>
    %121 = math.tanh %120 : vector<2x128xf32>
    %122 = arith.subf %102, %121 : vector<2x128xf32>
    %123 = arith.mulf %115, %122 : vector<2x128xf32>
    %124 = arith.addf %121, %123 : vector<2x128xf32>
    %c10 = arith.constant 10 : index
    %c0_30 = arith.constant 0 : index
    %125 = vector.load %arg8[%c10, %c0_30] : memref<16x384xf32, #tpu.memory_space<vmem>>, vector<2x384xf32>
    %126 = arith.truncf %124 : vector<2x128xf32> to vector<2x128xbf16>
    %cst_31 = arith.constant dense<0.000000e+00> : vector<2x384xf32>
    %127 = tpu.matmul %126, %10, %cst_31 {dimension_numbers = #tpu.dot_dimension_numbers<[1], [0], [0], [1], [0, 0, 1, 1], [], []>} : vector<2x128xbf16>, vector<128x384xbf16>, vector<2x384xf32> -> vector<2x384xf32>
    %128 = vector.extract_strided_slice %125 {offsets = [0, 0], sizes = [2, 256], strides = [1, 1]} : vector<2x384xf32> to vector<2x256xf32>
    %129 = vector.extract_strided_slice %127 {offsets = [0, 0], sizes = [2, 256], strides = [1, 1]} : vector<2x384xf32> to vector<2x256xf32>
    %130 = arith.addf %128, %129 : vector<2x256xf32>
    %131 = arith.negf %130 : vector<2x256xf32>
    %132 = math.exp %131 : vector<2x256xf32>
    %cst_32 = arith.constant 1.000000e+00 : f32
    %133 = vector.broadcast %cst_32 : f32 to vector<2x256xf32>
    %134 = arith.addf %133, %132 : vector<2x256xf32>
    %135 = arith.divf %133, %134 : vector<2x256xf32>
    %136 = vector.extract_strided_slice %135 {offsets = [0, 0], sizes = [2, 128], strides = [1, 1]} : vector<2x256xf32> to vector<2x128xf32>
    %137 = vector.extract_strided_slice %135 {offsets = [0, 128], sizes = [2, 128], strides = [1, 1]} : vector<2x256xf32> to vector<2x128xf32>
    %138 = vector.extract_strided_slice %125 {offsets = [0, 256], sizes = [2, 128], strides = [1, 1]} : vector<2x384xf32> to vector<2x128xf32>
    %139 = vector.extract_strided_slice %127 {offsets = [0, 256], sizes = [2, 128], strides = [1, 1]} : vector<2x384xf32> to vector<2x128xf32>
    %140 = arith.addf %139, %13 : vector<2x128xf32>
    %141 = arith.mulf %136, %140 : vector<2x128xf32>
    %142 = arith.addf %138, %141 : vector<2x128xf32>
    %143 = math.tanh %142 : vector<2x128xf32>
    %144 = arith.subf %124, %143 : vector<2x128xf32>
    %145 = arith.mulf %137, %144 : vector<2x128xf32>
    %146 = arith.addf %143, %145 : vector<2x128xf32>
    %c12 = arith.constant 12 : index
    %c0_33 = arith.constant 0 : index
    %147 = vector.load %arg8[%c12, %c0_33] : memref<16x384xf32, #tpu.memory_space<vmem>>, vector<2x384xf32>
    %148 = arith.truncf %146 : vector<2x128xf32> to vector<2x128xbf16>
    %cst_34 = arith.constant dense<0.000000e+00> : vector<2x384xf32>
    %149 = tpu.matmul %148, %10, %cst_34 {dimension_numbers = #tpu.dot_dimension_numbers<[1], [0], [0], [1], [0, 0, 1, 1], [], []>} : vector<2x128xbf16>, vector<128x384xbf16>, vector<2x384xf32> -> vector<2x384xf32>
    %150 = vector.extract_strided_slice %147 {offsets = [0, 0], sizes = [2, 256], strides = [1, 1]} : vector<2x384xf32> to vector<2x256xf32>
    %151 = vector.extract_strided_slice %149 {offsets = [0, 0], sizes = [2, 256], strides = [1, 1]} : vector<2x384xf32> to vector<2x256xf32>
    %152 = arith.addf %150, %151 : vector<2x256xf32>
    %153 = arith.negf %152 : vector<2x256xf32>
    %154 = math.exp %153 : vector<2x256xf32>
    %cst_35 = arith.constant 1.000000e+00 : f32
    %155 = vector.broadcast %cst_35 : f32 to vector<2x256xf32>
    %156 = arith.addf %155, %154 : vector<2x256xf32>
    %157 = arith.divf %155, %156 : vector<2x256xf32>
    %158 = vector.extract_strided_slice %157 {offsets = [0, 0], sizes = [2, 128], strides = [1, 1]} : vector<2x256xf32> to vector<2x128xf32>
    %159 = vector.extract_strided_slice %157 {offsets = [0, 128], sizes = [2, 128], strides = [1, 1]} : vector<2x256xf32> to vector<2x128xf32>
    %160 = vector.extract_strided_slice %147 {offsets = [0, 256], sizes = [2, 128], strides = [1, 1]} : vector<2x384xf32> to vector<2x128xf32>
    %161 = vector.extract_strided_slice %149 {offsets = [0, 256], sizes = [2, 128], strides = [1, 1]} : vector<2x384xf32> to vector<2x128xf32>
    %162 = arith.addf %161, %13 : vector<2x128xf32>
    %163 = arith.mulf %158, %162 : vector<2x128xf32>
    %164 = arith.addf %160, %163 : vector<2x128xf32>
    %165 = math.tanh %164 : vector<2x128xf32>
    %166 = arith.subf %146, %165 : vector<2x128xf32>
    %167 = arith.mulf %159, %166 : vector<2x128xf32>
    %168 = arith.addf %165, %167 : vector<2x128xf32>
    %c14 = arith.constant 14 : index
    %c0_36 = arith.constant 0 : index
    %169 = vector.load %arg8[%c14, %c0_36] : memref<16x384xf32, #tpu.memory_space<vmem>>, vector<2x384xf32>
    %170 = arith.truncf %168 : vector<2x128xf32> to vector<2x128xbf16>
    %cst_37 = arith.constant dense<0.000000e+00> : vector<2x384xf32>
    %171 = tpu.matmul %170, %10, %cst_37 {dimension_numbers = #tpu.dot_dimension_numbers<[1], [0], [0], [1], [0, 0, 1, 1], [], []>} : vector<2x128xbf16>, vector<128x384xbf16>, vector<2x384xf32> -> vector<2x384xf32>
    %172 = vector.extract_strided_slice %169 {offsets = [0, 0], sizes = [2, 256], strides = [1, 1]} : vector<2x384xf32> to vector<2x256xf32>
    %173 = vector.extract_strided_slice %171 {offsets = [0, 0], sizes = [2, 256], strides = [1, 1]} : vector<2x384xf32> to vector<2x256xf32>
    %174 = arith.addf %172, %173 : vector<2x256xf32>
    %175 = arith.negf %174 : vector<2x256xf32>
    %176 = math.exp %175 : vector<2x256xf32>
    %cst_38 = arith.constant 1.000000e+00 : f32
    %177 = vector.broadcast %cst_38 : f32 to vector<2x256xf32>
    %178 = arith.addf %177, %176 : vector<2x256xf32>
    %179 = arith.divf %177, %178 : vector<2x256xf32>
    %180 = vector.extract_strided_slice %179 {offsets = [0, 0], sizes = [2, 128], strides = [1, 1]} : vector<2x256xf32> to vector<2x128xf32>
    %181 = vector.extract_strided_slice %179 {offsets = [0, 128], sizes = [2, 128], strides = [1, 1]} : vector<2x256xf32> to vector<2x128xf32>
    %182 = vector.extract_strided_slice %169 {offsets = [0, 256], sizes = [2, 128], strides = [1, 1]} : vector<2x384xf32> to vector<2x128xf32>
    %183 = vector.extract_strided_slice %171 {offsets = [0, 256], sizes = [2, 128], strides = [1, 1]} : vector<2x384xf32> to vector<2x128xf32>
    %184 = arith.addf %183, %13 : vector<2x128xf32>
    %185 = arith.mulf %180, %184 : vector<2x128xf32>
    %186 = arith.addf %182, %185 : vector<2x128xf32>
    %187 = math.tanh %186 : vector<2x128xf32>
    %188 = arith.subf %168, %187 : vector<2x128xf32>
    %189 = arith.mulf %181, %188 : vector<2x128xf32>
    %190 = arith.addf %187, %189 : vector<2x128xf32>
    %c0_39 = arith.constant 0 : index
    %c0_40 = arith.constant 0 : index
    %191 = vector.load %arg7[%c0_39, %c0_40] : memref<2x128xf32, #tpu.memory_space<vmem>>, vector<2x128xf32>
    tpu.vector_store %arg7[%c0_39, %c0_40], %190 {strides = array<i32>} : memref<2x128xf32, #tpu.memory_space<vmem>>, vector<2x128xf32>,
    %c0_i32_41 = arith.constant 0 : i32
    %192 = arith.cmpi eq, %arg0, %c0_i32_41 : i32
    %193 = arith.extui %192 : i1 to i32
    %c0_i32_42 = arith.constant 0 : i32
    %194 = arith.cmpi ne, %193, %c0_i32_42 : i32
    scf.if %194 {
      %c0_43 = arith.constant 0 : index
      %c0_44 = arith.constant 0 : index
      %c0_45 = arith.constant 0 : index
      %195 = vector.load %arg6[%c0_43, %c0_44, %c0_45] : memref<1x2x128xf32, #tpu.memory_space<vmem>>, vector<1x2x128xf32>
      %196 = vector.shape_cast %195 : vector<1x2x128xf32> to vector<2x128xf32>
      %197 = vector.shape_cast %190 : vector<2x128xf32> to vector<1x2x128xf32>
      tpu.vector_store %arg6[%c0_43, %c0_44, %c0_45], %197 {strides = array<i32>} : memref<1x2x128xf32, #tpu.memory_space<vmem>>, vector<1x2x128xf32>,
    } else {
    }
    return
  }
  func.func @transform_0(%arg0: i32) -> (i32, i32) {
    %c0_i32 = arith.constant 0 : i32
    %c0_i32_0 = arith.constant 0 : i32
    return %arg0, %c0_i32 : i32, i32
  }
  func.func @transform_1(%arg0: i32) -> (i32, i32) {
    %c0_i32 = arith.constant 0 : i32
    %c0_i32_0 = arith.constant 0 : i32
    %c0_i32_1 = arith.constant 0 : i32
    return %c0_i32, %c0_i32_0 : i32, i32
  }
  func.func @transform_2(%arg0: i32) -> (i32, i32) {
    %c0_i32 = arith.constant 0 : i32
    %c0_i32_0 = arith.constant 0 : i32
    %c0_i32_1 = arith.constant 0 : i32
    return %c0_i32, %c0_i32_0 : i32, i32
  }
  func.func @transform_3(%arg0: i32) -> (i32, i32) {
    %c0_i32 = arith.constant 0 : i32
    %c0_i32_0 = arith.constant 0 : i32
    %c0_i32_1 = arith.constant 0 : i32
    return %c0_i32, %c0_i32_0 : i32, i32
  }
  func.func @transform_4(%arg0: i32) -> (i32, i32) {
    %c0_i32 = arith.constant 0 : i32
    %c0_i32_0 = arith.constant 0 : i32
    %c0_i32_1 = arith.constant 0 : i32
    return %c0_i32, %c0_i32_0 : i32, i32
  }
  func.func @transform_5(%arg0: i32) -> (i32, i32, i32) {
    %c0_i32 = arith.constant 0 : i32
    %c0_i32_0 = arith.constant 0 : i32
    %c0_i32_1 = arith.constant 0 : i32
    %c0_i32_2 = arith.constant 0 : i32
    return %c0_i32, %c0_i32_0, %c0_i32_1 : i32, i32, i32
  }
}

</mosaic_0001>

<bundles_post_ra>
// kernel: encoder_forward.1
= control target key start
LH: loop header
LB: loop body
LE: loop exit
PB: predicated region body
PF: predicated region fallthrough
CT: control target
= control target key end

     0   :  { %vm82_vm0 = vcmask 261120   ;;  %v1435_v45 = vmov 0.0   ;;  %s1954_s0 = inlined_call_operand.vmem [shape: bf16[16,32], index: 0, kind: input, shape index: {}]   ;;  %s1955_s1 = inlined_call_operand.vmem [shape: bf16[32,384], index: 1, kind: input, shape index: {}]   ;;  %s1956_s2 = inlined_call_operand.vmem [shape: bf16[128,384], index: 2, kind: input, shape index: {}]   ;;  %s1957_s3 = inlined_call_operand.vmem [shape: f32[1,384], index: 3, kind: input, shape index: {}]   ;;  %s1958_s4 = inlined_call_operand.vmem [shape: f32[1,128], index: 4, kind: input, shape index: {}]   ;;  %s1959_s5 = inlined_call_operand.hbm [shape: f32[1,2,128], index: 5, kind: output, shape index: {}]  }
   0x1   :  { %v1268_v0 = vld [vmem:[%s1956_s2 + $0xa8] sm:$0xf]  ;;  %v1323_v1 = vld [vmem:[%s1956_s2 + $0xb0] sm:$0xf0]  ;;  %v1169_v2 = vld [vmem:[%s1955_s1 + $0x18] sm:$0xf] }
   0x2   :  { %v1476_v3 = vor.u32 %v1323_v1, %v1268_v0  ;;  %v1299_v4 = vld [vmem:[%s1955_s1 + $0x20] sm:$0xf0]  ;;  %v1256_v5 = vld [vmem:[%s1956_s2 + $0x90] sm:$0xf]  ;;  %v1320_v6 = vld [vmem:[%s1956_s2 + $0x98] sm:$0xf0] }
   0x3   :  { %v1170_v7 = vor.u32 %v1299_v4, %v1169_v2  ;;  %v1157_v8 = vld [vmem:[%s1955_s1] sm:$0xf]  ;;  %v1296_v9 = vld [vmem:[%s1955_s1 + $0x8] sm:$0xf0]  ;;  %v1497_v11 = vor.u32 %v1320_v6, %v1256_v5  ;;  %v1270_v12 = vld [vmem:[%s1956_s2 + $0xb4] sm:$0xf0] }
   0x4   :  { %v1322_v10 = vld [vmem:[%s1956_s2 + $0xac] sm:$0xf]  ;;  %303 = vmatpush.bf16.msra.mxu3 %v1476_v3  ;;  %v1158_v13 = vor.u32 %v1296_v9, %v1157_v8  ;;  %v1244_v14 = vld [vmem:[%s1956_s2 + $0x78] sm:$0xf]  ;;  %v1317_v15 = vld [vmem:[%s1956_s2 + $0x80] sm:$0xf0] }
   0x5   :  { %92 = vmatpush.bf16.msra.mxu0 %v1170_v7  ;;  %v1508_v16 = vor.u32 %v1322_v10, %v1270_v12  ;;  %v1319_v17 = vld [vmem:[%s1956_s2 + $0x94] sm:$0xf]  ;;  %v1258_v18 = vld [vmem:[%s1956_s2 + $0x9c] sm:$0xf0]  ;;  %v1517_v19 = vor.u32 %v1317_v15, %v1244_v14  ;;  %v1298_v22 = vld [vmem:[%s1955_s1 + $0x1c] sm:$0xf] }
   0x6   :  { %v1232_v20 = vld [vmem:[%s1956_s2 + $0x60] sm:$0xf]  ;;  %v1314_v23 = vld [vmem:[%s1956_s2 + $0x68] sm:$0xf0]  ;;  %v1171_v24 = vld [vmem:[%s1955_s1 + $0x24] sm:$0xf0]  ;;  %v1537_v25 = vor.u32 %v1319_v17, %v1258_v18 }
   0x7   :  { %v1525_v21 = vld [vmem:[%s1954_s0] sm:$0xff]  ;;  %v1174_v26 = vor.u32 %v1298_v22, %v1171_v24  ;;  %v1316_v28 = vld [vmem:[%s1956_s2 + $0x7c] sm:$0xf]  ;;  %v1246_v29 = vld [vmem:[%s1956_s2 + $0x84] sm:$0xf0]  ;;  %v1552_v31 = vor.u32 %v1314_v23, %v1232_v20 }
   0x8   :  { %304 = vmatpush.bf16.msra.mxu3 %v1497_v11  ;;  %v1295_v27 = vld [vmem:[%s1955_s1 + $0x4] sm:$0xf]  ;;  %v1159_v30 = vld [vmem:[%s1955_s1 + $0xc] sm:$0xf0]  ;;  %v1220_v33 = vld [vmem:[%s1956_s2 + $0x48] sm:$0xf]  ;;  %v1569_v37 = vor.u32 %v1316_v28, %v1246_v29 }
   0x9   :  { %93 = vmatpush.bf16.msra.mxu0 %v1158_v13  ;;  %v1276_v32 = vld [vmem:[%s1956_s2 + $0xb0] sm:$0xf]  ;;  %v1311_v34 = vld [vmem:[%s1956_s2 + $0x50] sm:$0xf0]  ;;  %106 = vmatpush.bf16.msra.mxu1 %v1174_v26  ;;  %v1162_v35 = vor.u32 %v1295_v27, %v1159_v30  ;;  %v1324_v36 = vld [vmem:[%s1956_s2 + $0xb8] sm:$0xf0] }
   0xa   :  { %v1313_v38 = vld [vmem:[%s1956_s2 + $0x64] sm:$0xf]  ;;  %v1234_v39 = vld [vmem:[%s1956_s2 + $0x6c] sm:$0xf0]  ;;  %v1577_v40 = vor.u32 %v1324_v36, %v1276_v32  ;;  %v1264_v41 = vld [vmem:[%s1956_s2 + $0x98] sm:$0xf]  ;;  %v1586_v43 = vor.u32 %v1311_v34, %v1220_v33 }
   0xb   :  { %v1321_v42 = vld [vmem:[%s1956_s2 + $0xa0] sm:$0xf0]  ;;  %v1208_v44 = vld [vmem:[%s1956_s2 + $0x30] sm:$0xf]  ;;  %26 = vst [vmem:[#allocation2] sm:$0x3] %v1435_v45  ;;  %v1601_v49 = vor.u32 %v1313_v38, %v1234_v39 }
   0xc   :  { %305 = vmatpush.bf16.msra.mxu3 %v1517_v19  ;;  %1179 = vmatmul.msk.bf16.vlgmr.msra.gmra.mxu0 %vm82_vm0, %v1525_v21  ;;  %v1308_v46 = vld [vmem:[%s1956_s2 + $0x38] sm:$0xf0]  ;;  %v1177_v47 = vld [vmem:[%s1955_s1 + $0x20] sm:$0xf]  ;;  %v1300_v48 = vld [vmem:[%s1955_s1 + $0x28] sm:$0xf0]  ;;  %v1610_v52 = vor.u32 %v1321_v42, %v1264_v41 }
   0xd   :  { %316 = vmatpush.bf16.msrb.mxu0 %v1508_v16  ;;  %107 = vmatpush.bf16.msra.mxu1 %v1162_v35  ;;  %v1310_v50 = vld [vmem:[%s1956_s2 + $0x4c] sm:$0xf]  ;;  %v1222_v51 = vld [vmem:[%s1956_s2 + $0x54] sm:$0xf0]  ;;  %v1178_v53 = vor.u32 %v1300_v48, %v1177_v47  ;;  %v1165_v54 = vld [vmem:[%s1955_s1 + $0x8] sm:$0xf]  ;;  %v1625_v58 = vor.u32 %v1308_v46, %v1208_v44 }
   0xe   :  { %v1252_v55 = vld [vmem:[%s1956_s2 + $0x80] sm:$0xf]  ;;  %v1318_v56 = vld [vmem:[%s1956_s2 + $0x88] sm:$0xf0]  ;;  %v1297_v57 = vld [vmem:[%s1955_s1 + $0x10] sm:$0xf0]  ;;  %v1636_v62 = vor.u32 %v1310_v50, %v1222_v51 }
   0xf   :  { %v1196_v59 = vld [vmem:[%s1956_s2 + $0x18] sm:$0xf]  ;;  %v1305_v60 = vld [vmem:[%s1956_s2 + $0x20] sm:$0xf0]  ;;  %120 = vmatpush.bf16.msra.mxu2 %v1178_v53  ;;  %v1166_v61 = vor.u32 %v1297_v57, %v1165_v54  ;;  %v1307_v63 = vld [vmem:[%s1956_s2 + $0x34] sm:$0xf]  ;;  %v1642_v0 = vor.u32 %v1318_v56, %v1252_v55 }
  0x10   :  { %306 = vmatpush.bf16.msra.mxu3 %v1552_v31  ;;  %1180 = vmatmul.msk.bf16.vlgmr.msra.gmra.mxu1 %vm82_vm0, %v1525_v21 }
  0x11   :  { %317 = vmatpush.bf16.msrb.mxu0 %v1537_v25  ;;  %329 = vmatpush.bf16.msrb.mxu1 %v1577_v40 }
  0x14   :  { %307 = vmatpush.bf16.msra.mxu3 %v1586_v43 }
  0x15   :  { %318 = vmatpush.bf16.msrb.mxu0 %v1569_v37  ;;  %330 = vmatpush.bf16.msrb.mxu1 %v1610_v52 }
  0x19   :  { %319 = vmatpush.bf16.msrb.mxu0 %v1601_v49 }
  0x1a   :  { %10 = vsyncpa [#allocation5], 0  ;;  %v1210_v1 = vld [vmem:[%s1956_s2 + $0x3c] sm:$0xf0]  ;;  %v1240_v2 = vld [vmem:[%s1956_s2 + $0x68] sm:$0xf]  ;;  %308 = vmatpush.bf16.msra.mxu3 %v1625_v58  ;;  %v1654_v5 = vor.u32 %v1305_v60, %v1196_v59  ;;  %121 = vmatpush.bf16.msra.mxu2 %v1166_v61 }
  0x1b   :  { %v1315_v4 = vld [vmem:[%s1956_s2 + $0x70] sm:$0xf0]  ;;  %v1184_v6 = vld [vmem:[%s1956_s2] sm:$0xf]  ;;  %v1302_v7 = vld [vmem:[%s1956_s2 + $0x8] sm:$0xf0]  ;;  %v1663_v8 = vor.u32 %v1307_v63, %v1210_v1  ;;  %331 = vmatpush.bf16.msrb.mxu1 %v1642_v0 }
  0x1c   :  { %v1304_v9 = vld [vmem:[%s1956_s2 + $0x1c] sm:$0xf]  ;;  %v1669_v10 = vor.u32 %v1315_v4, %v1240_v2  ;;  %v1198_v12 = vld [vmem:[%s1956_s2 + $0x24] sm:$0xf0]  ;;  %v1228_v13 = vld [vmem:[%s1956_s2 + $0x50] sm:$0xf]  ;;  %v1682_v15 = vor.u32 %v1302_v7, %v1184_v6 }
  0x1d   :  { %320 = vmatpush.bf16.msrb.mxu0 %v1636_v62  ;;  %v1312_v14 = vld [vmem:[%s1956_s2 + $0x58] sm:$0xf0]  ;;  %v1684_v17 = vld [vmem:[#allocation2] sm:$0x3]  ;;  %1181 = vmatmul.msk.bf16.vlgmr.msra.gmra.mxu2 %vm82_vm0, %v1525_v21  ;;  %v1689_v18 = vor.u32 %v1304_v9, %v1198_v12  ;;  %v1301_v20 = vld [vmem:[%s1956_s2 + $0x4] sm:$0xf] }
  0x1e   :  { %393 = vmatpush.bf16.msrb.mxu2 %v1476_v3  ;;  %309 = vmatpush.bf16.msra.mxu3 %v1654_v5  ;;  %v1695_v22 = vor.u32 %v1312_v14, %v1228_v13  ;;  %v174_v23 = vpack.c.bf16 %v1684_v17, %v1684_v17  ;;  %v1186_v24 = vld [vmem:[%s1956_s2 + $0xc] sm:$0xf0]  ;;  %v1216_v21 = vld [vmem:[%s1956_s2 + $0x38] sm:$0xf]  ;;  %v1309_v26 = vld [vmem:[%s1956_s2 + $0x40] sm:$0xf0] }
  0x1f   :  { %332 = vmatpush.bf16.msrb.mxu1 %v1669_v10  ;;  %v1712_v27 = vor.u32 %v1301_v20, %v1186_v24  ;;  %v1715_v28 = vor.u32 %v1309_v26, %v1216_v21  ;;  %v1204_v29 = vld [vmem:[%s1956_s2 + $0x20] sm:$0xf]  ;;  %v1306_v30 = vld [vmem:[%s1956_s2 + $0x28] sm:$0xf0]  ;;  %v1192_v33 = vld [vmem:[%s1956_s2 + $0x8] sm:$0xf] }
  0x20   :  { %v1727_v32 = vor.u32 %v1306_v30, %v1204_v29  ;;  %v1303_v34 = vld [vmem:[%s1956_s2 + $0x10] sm:$0xf0]  ;;  %v37_v36 = vld [vmem:[%s1957_s3] sm:$0x7]  ;;  %s1142_s16 = sshll.u32 %s1959_s5, 4  ;;  %s1143_s16 = int_to_ptr.hbm [resolvable:$true] %s1142_s16 }
  0x21   :  { %321 = vmatpush.bf16.msrb.mxu0 %v1663_v8  ;;  %v1739_v35 = vor.u32 %v1303_v34, %v1192_v33  ;;  %v39_v38 = vperm.slane %v37_v36, 0  ;;  %v40_v42 = vperm.slane %v37_v36, 1  ;;  %v41_v51 = vperm.slane %v37_v36, 2  ;;  %v1804_v29 = vld [vmem:[%s1958_s4] ss:$0 sm:$0xff] }
  0x22   :  { %394 = vmatpush.bf16.msrb.mxu2 %v1497_v11  ;;  %310 = vmatpush.bf16.msra.mxu3 %v1682_v15 }
  0x23   :  { %333 = vmatpush.bf16.msrb.mxu1 %v1695_v22 }
  0x25   :  { %322 = vmatpush.bf16.msrb.mxu0 %v1689_v18  ;;  %311 = vmatmul.bf16.vlgmr.msra.gmra.mxu3 %v174_v23 }
  0x26   :  { %406 = vmatpush.bf16.msrb.mxu3 %v1508_v16  ;;  %395 = vmatpush.bf16.msrb.mxu2 %v1517_v19 }
  0x27   :  { %334 = vmatpush.bf16.msrb.mxu1 %v1715_v28 }
  0x29   :  { %323 = vmatpush.bf16.msrb.mxu0 %v1712_v27 }
  0x2a   :  { %407 = vmatpush.bf16.msrb.mxu3 %v1537_v25  ;;  %396 = vmatpush.bf16.msrb.mxu2 %v1552_v31 }
  0x2b   :  { %335 = vmatpush.bf16.msrb.mxu1 %v1727_v32 }
  0x2c   :  { %324 = vmatmul.bf16.vlgmr.msrb.gmra.mxu0 %v174_v23 }
  0x2d   :  { %419 = vmatpush.bf16.msra.mxu0 %v1577_v40 }
  0x2e   :  { %408 = vmatpush.bf16.msrb.mxu3 %v1569_v37  ;;  %397 = vmatpush.bf16.msrb.mxu2 %v1586_v43 }
  0x2f   :  { %336 = vmatpush.bf16.msrb.mxu1 %v1739_v35 }
  0x31   :  { %420 = vmatpush.bf16.msra.mxu0 %v1610_v52 }
  0x32   :  { %409 = vmatpush.bf16.msrb.mxu3 %v1601_v49  ;;  %398 = vmatpush.bf16.msrb.mxu2 %v1625_v58 }
  0x33   :  { %501 = vmatpush.bf16.msra.mxu1 %v1476_v3 }
  0x34   :  { %337 = vmatmul.bf16.vlgmr.msrb.gmra.mxu1 %v174_v23 }
  0x35   :  { %421 = vmatpush.bf16.msra.mxu0 %v1642_v0 }
  0x36   :  { %410 = vmatpush.bf16.msrb.mxu3 %v1636_v62  ;;  %399 = vmatpush.bf16.msrb.mxu2 %v1654_v5 }
  0x37   :  { %502 = vmatpush.bf16.msra.mxu1 %v1497_v11 }
  0x39   :  { %422 = vmatpush.bf16.msra.mxu0 %v1669_v10 }
  0x3a   :  { %411 = vmatpush.bf16.msrb.mxu3 %v1663_v8  ;;  %400 = vmatpush.bf16.msrb.mxu2 %v1682_v15 }
  0x3b   :  { %503 = vmatpush.bf16.msra.mxu1 %v1517_v19 }
  0x3d   :  { %423 = vmatpush.bf16.msra.mxu0 %v1695_v22 }
  0x3e   :  { %514 = vmatpush.bf16.msra.mxu2 %v1508_v16  ;;  %412 = vmatpush.bf16.msrb.mxu3 %v1689_v18 }
  0x3f   :  { %504 = vmatpush.bf16.msra.mxu1 %v1552_v31 }
  0x41   :  { %424 = vmatpush.bf16.msra.mxu0 %v1715_v28 }
  0x42   :  { %515 = vmatpush.bf16.msra.mxu2 %v1537_v25  ;;  %413 = vmatpush.bf16.msrb.mxu3 %v1712_v27 }
  0x43   :  { %505 = vmatpush.bf16.msra.mxu1 %v1586_v43 }
  0x45   :  { %425 = vmatpush.bf16.msra.mxu0 %v1727_v32 }
  0x46   :  { %527 = vmatpush.bf16.msra.mxu3 %v1577_v40  ;;  %516 = vmatpush.bf16.msra.mxu2 %v1569_v37 }
  0x47   :  { %506 = vmatpush.bf16.msra.mxu1 %v1625_v58 }
  0x49   :  { %426 = vmatpush.bf16.msra.mxu0 %v1739_v35 }
  0x4a   :  { %528 = vmatpush.bf16.msra.mxu3 %v1610_v52  ;;  %517 = vmatpush.bf16.msra.mxu2 %v1601_v49 }
  0x4b   :  { %507 = vmatpush.bf16.msra.mxu1 %v1654_v5 }
  0x4d   :  { %609 = vmatpush.bf16.msrb.mxu0 %v1476_v3 }
  0x4e   :  { %529 = vmatpush.bf16.msra.mxu3 %v1642_v0  ;;  %518 = vmatpush.bf16.msra.mxu2 %v1636_v62 }
  0x4f   :  { %508 = vmatpush.bf16.msra.mxu1 %v1682_v15 }
  0x51   :  { %610 = vmatpush.bf16.msrb.mxu0 %v1497_v11 }
  0x52   :  { %530 = vmatpush.bf16.msra.mxu3 %v1669_v10  ;;  %519 = vmatpush.bf16.msra.mxu2 %v1663_v8 }
  0x53   :  { %622 = vmatpush.bf16.msrb.mxu1 %v1508_v16 }
  0x55   :  { %611 = vmatpush.bf16.msrb.mxu0 %v1517_v19 }
  0x56   :  { %531 = vmatpush.bf16.msra.mxu3 %v1695_v22  ;;  %520 = vmatpush.bf16.msra.mxu2 %v1689_v18 }
  0x57   :  { %623 = vmatpush.bf16.msrb.mxu1 %v1537_v25 }
  0x59   :  { %612 = vmatpush.bf16.msrb.mxu0 %v1552_v31 }
  0x5a   :  { %532 = vmatpush.bf16.msra.mxu3 %v1715_v28  ;;  %521 = vmatpush.bf16.msra.mxu2 %v1712_v27 }
  0x5b   :  { %624 = vmatpush.bf16.msrb.mxu1 %v1569_v37 }
  0x5d   :  { %613 = vmatpush.bf16.msrb.mxu0 %v1586_v43 }
  0x5e   :  { %533 = vmatpush.bf16.msra.mxu3 %v1727_v32 }
  0x5f   :  { %625 = vmatpush.bf16.msrb.mxu1 %v1601_v49 }
  0x61   :  { %614 = vmatpush.bf16.msrb.mxu0 %v1625_v58 }
  0x62   :  { %534 = vmatpush.bf16.msra.mxu3 %v1739_v35 }
  0x63   :  { %626 = vmatpush.bf16.msrb.mxu1 %v1636_v62 }
  0x65   :  { %615 = vmatpush.bf16.msrb.mxu0 %v1654_v5 }
  0x67   :  { %627 = vmatpush.bf16.msrb.mxu1 %v1663_v8 }
  0x69   :  { %616 = vmatpush.bf16.msrb.mxu0 %v1682_v15 }
  0x6b   :  { %628 = vmatpush.bf16.msrb.mxu1 %v1689_v18 }
  0x6f   :  { %629 = vmatpush.bf16.msrb.mxu1 %v1712_v27 }
  0x89   :  { %v95_v39 = vpop.f32.mrf.mxu0 }
  0x8a   :  { %v96_v41 = vadd.f32 %v95_v39, %v39_v38 }
  0x8c   :  { %128 = vst [vmem:[#allocation3 + $0x28] sm:$0xff] %v96_v41 }
  0x8d   :  { %v109_v45 = vpop.f32.mrf.mxu1 }
  0x8e   :  { %v110_v47 = vadd.f32 %v109_v45, %v40_v42 }
  0x90   :  { %129 = vst [vmem:[#allocation3 + $0x10] sm:$0xff] %v110_v47 }
  0x91   :  { %v97_v44 = vpop.f32.mrf.mxu0 }
  0x92   :  { %v98_v46 = vadd.f32 %v97_v44, %v39_v38 }
  0x93   :  { %v171_v55 = vld [vmem:[#allocation3 + $0x28] sm:$0x3] }
  0x94   :  { %131 = vst [vmem:[#allocation3] sm:$0xff] %v98_v46 }
  0x95   :  { %v111_v48 = vpop.f32.mrf.mxu1 }
  0x96   :  { %v112_v50 = vadd.f32 %v111_v48, %v40_v42 }
  0x97   :  { %v172_v56 = vld [vmem:[#allocation3 + $0x10] sm:$0x3] }
  0x98   :  { %132 = vst [vmem:[#allocation3 + $0x18] sm:$0xff] %v112_v50 }
  0xa0   :  { %v123_v53 = vpop.f32.mrf.mxu2 }
  0xa1   :  { %v124_v54 = vadd.f32 %v123_v53, %v41_v51 }
  0xa3   :  { %130 = vst [vmem:[#allocation3 + $0x8] sm:$0xff] %v124_v54 }
  0xa8   :  { %v312_v57 = vpop.f32.mrf.mxu3  ;;  %v125_v63 = vpop.f32.mrf.mxu2 }
  0xa9   :  { %v325_v59 = vpop.f32.mrf.mxu0  ;;  %v342_v60 = vadd.f32 %v312_v57, %v171_v55  ;;  %v126_v1 = vadd.f32 %v125_v63, %v41_v51 }
  0xaa   :  { %v343_v61 = vadd.f32 %v325_v59, %v172_v56  ;;  %v173_v46 = vld [vmem:[#allocation3 + $0x8] sm:$0x3] }
  0xab   :  { %v1278_v2 = vmul.f32 -1.442695, %v342_v60  ;;  %133 = vst [vmem:[#allocation3 + $0x20] sm:$0xff] %v126_v1 }
  0xac   :  { %v1279_v4 = vmul.f32 -1.442695, %v343_v61 }
  0xad   :  { %1328 = vpow2.f32 %v1278_v2 }
  0xae   :  { %1330 = vpow2.f32 %v1279_v4 }
  0xb0   :  { %v314_v6 = vpop.f32.mrf.mxu3 }
  0xb1   :  { %v327_v7 = vpop.f32.mrf.mxu0  ;;  %v338_v9 = vpop.f32.mrf.mxu1 }
  0xb2   :  { %v382_v41 = vadd.f32 %v1804_v29, %v338_v9 }
  0xb3   :  { %v1329_v12 = vpop.eup %1328 }
  0xb4   :  { %v1331_v13 = vpop.eup %1330  ;;  %v350_v14 = vadd.f32 1.0, %v1329_v12  ;;  %v389_v12 = vld [vmem:[#allocation3 + $0x28] sm:$0xc] }
  0xb5   :  { %v351_v20 = vadd.f32 1.0, %v1331_v13  ;;  %v390_v13 = vld [vmem:[#allocation3 + $0x10] sm:$0xc] }
  0xb6   :  { %1332 = vrcp.f32 %v350_v14  ;;  %v363_v34 = vand.u32 2147483648, %v350_v14  ;;  %v361_v38 = vand.u32 2147483647, %v350_v14  ;;  %vm357_vm2 = vweird.f32 %v350_v14 }
  0xb7   :  { %1334 = vrcp.f32 %v351_v20  ;;  %vm372_vm5 = vweird.f32 %v351_v20  ;;  %v378_v53 = vand.u32 2147483648, %v351_v20  ;;  %v376_v55 = vand.u32 2147483647, %v351_v20 }
  0xb8   :  { %v364_v44 = vor.u32 1.1754944e-38, %v363_v34  ;;  %vm362_vm4 = vcmp.eq.f32.partialorder %v361_v38, 8.507059e+37 }
  0xb9   :  { %v340_v23 = vpop.f32.mrf.mxu1  ;;  %v379_v56 = vor.u32 1.1754944e-38, %v378_v53  ;;  %vm377_vm8 = vcmp.eq.f32.partialorder %v376_v55, 8.507059e+37 }
  0xbc   :  { %v1333_v24 = vpop.eup %1332 }
  0xbd   :  { %v1335_v21 = vpop.eup %1334  ;;  %v353_v26 = vmul.f32 %v1333_v24, %v350_v14  ;;  %vm358_vm1 = vweird.f32 %v1333_v24 }
  0xbe   :  { %v368_v33 = vmul.f32 %v1335_v21, %v351_v20  ;;  %vm359_vm3 = vmor %vm357_vm2, %vm358_vm1  ;;  %vm373_vm6 = vweird.f32 %v1335_v21 }
  0xbf   :  { %v354_v30 = vsub.f32 1.0, %v353_v26  ;;  %vm374_vm7 = vmor %vm372_vm5, %vm373_vm6 }
  0xc0   :  { %v369_v42 = vsub.f32 1.0, %v368_v33 }
  0xc1   :  { %v355_v36 = vmul.f32 %v1333_v24, %v354_v30 }
  0xc2   :  { %v370_v50 = vmul.f32 %v1335_v21, %v369_v42 }
  0xc3   :  { %v356_v39 = vadd.f32 %v1333_v24, %v355_v36 }
  0xc4   :  { %v371_v54 = vadd.f32 %v1335_v21, %v370_v50 }
  0xc5   :  { %v360_v45 = vsel %vm359_vm3, %v1333_v24, %v356_v39 }
  0xc6   :  { %v365_v47 = vsel %vm362_vm4, %v364_v44, %v360_v45  ;;  %v375_v57 = vsel %vm374_vm7, %v1335_v21, %v371_v54 }
  0xc7   :  { %v383_v48 = vmul.f32 %v382_v41, %v365_v47  ;;  %v380_v61 = vsel %vm377_vm8, %v379_v56, %v375_v57 }
  0xc9   :  { %v384_v51 = vadd.f32 %v383_v48, %v173_v46 }
  0xcb   :  { %1336 = vtanh.f32 %v384_v51 }
  0xd1   :  { %v1337_v59 = vpop.eup %1336 }
  0xd2   :  { %v386_v60 = vsub.f32 %v1684_v17, %v1337_v59 }
  0xd4   :  { %v387_v63 = vmul.f32 %v386_v60, %v380_v61  ;;  %v391_v60 = vld [vmem:[#allocation3 + $0x8] sm:$0xc] }
  0xd6   :  { %v1808_v1 = vadd.f32 %v1337_v59, %v387_v63 }
  0xd8   :  { %v392_v2 = vpack.c.bf16 %v1808_v1, %v1808_v1 }
  0xda   :  { %401 = vmatmul.bf16.vlgmr.msrb.gmra.mxu2 %v392_v2  ;;  %414 = vmatmul.bf16.vlgmr.msrb.gmra.mxu3 %v392_v2 }
  0xdb   :  { %427 = vmatmul.bf16.vlgmr.msra.gmra.mxu0 %v392_v2  ;;  %635 = vmatpush.bf16.msrb.mxu2 %v1577_v40 }
  0xdc   :  { %717 = vmatpush.bf16.msrb.mxu3 %v1476_v3  ;;  %730 = vmatpush.bf16.msra.mxu0 %v1508_v16 }
  0xdf   :  { %636 = vmatpush.bf16.msrb.mxu2 %v1610_v52 }
  0xe0   :  { %718 = vmatpush.bf16.msrb.mxu3 %v1497_v11  ;;  %731 = vmatpush.bf16.msra.mxu0 %v1537_v25 }
  0xe3   :  { %637 = vmatpush.bf16.msrb.mxu2 %v1642_v0 }
  0xe4   :  { %719 = vmatpush.bf16.msrb.mxu3 %v1517_v19  ;;  %732 = vmatpush.bf16.msra.mxu0 %v1569_v37 }
  0xe7   :  { %638 = vmatpush.bf16.msrb.mxu2 %v1669_v10 }
  0xe8   :  { %720 = vmatpush.bf16.msrb.mxu3 %v1552_v31  ;;  %733 = vmatpush.bf16.msra.mxu0 %v1601_v49 }
  0xeb   :  { %639 = vmatpush.bf16.msrb.mxu2 %v1695_v22 }
  0xec   :  { %721 = vmatpush.bf16.msrb.mxu3 %v1586_v43  ;;  %734 = vmatpush.bf16.msra.mxu0 %v1636_v62 }
  0xef   :  { %640 = vmatpush.bf16.msrb.mxu2 %v1715_v28 }
  0xf0   :  { %722 = vmatpush.bf16.msrb.mxu3 %v1625_v58  ;;  %735 = vmatpush.bf16.msra.mxu0 %v1663_v8 }
  0xf3   :  { %641 = vmatpush.bf16.msrb.mxu2 %v1727_v32 }
  0xf4   :  { %723 = vmatpush.bf16.msrb.mxu3 %v1654_v5  ;;  %736 = vmatpush.bf16.msra.mxu0 %v1689_v18 }
  0xf7   :  { %642 = vmatpush.bf16.msrb.mxu2 %v1739_v35 }
  0xf8   :  { %724 = vmatpush.bf16.msrb.mxu3 %v1682_v15  ;;  %737 = vmatpush.bf16.msra.mxu0 %v1712_v27 }
 0x158   :  { %v428_v17 = vpop.f32.mrf.mxu0 }
 0x159   :  { %v478_v46 = vadd.f32 %v1804_v29, %v428_v17 }
 0x15b   :  { %v480_v54 = vrot.slane %v478_v46, 6 }
 0x15d   :  { %v402_v4 = vpop.f32.mrf.mxu2  ;;  %v415_v6 = vpop.f32.mrf.mxu3 }
 0x15e   :  { %v434_v7 = vrot.slane %v402_v4, 6  ;;  %v435_v9 = vrot.slane %v415_v6, 6 }
 0x160   :  { %v438_v14 = vadd.f32 %v434_v7, %v389_v12  ;;  %v439_v20 = vadd.f32 %v435_v9, %v390_v13  ;;  %v430_v23 = vpop.f32.mrf.mxu0 }
 0x162   :  { %v1280_v24 = vmul.f32 -1.442695, %v438_v14  ;;  %v1281_v21 = vmul.f32 -1.442695, %v439_v20 }
 0x164   :  { %1338 = vpow2.f32 %v1280_v24 }
 0x165   :  { %1340 = vpow2.f32 %v1281_v21  ;;  %v404_v26 = vpop.f32.mrf.mxu2  ;;  %v417_v30 = vpop.f32.mrf.mxu3 }
 0x16a   :  { %v1339_v33 = vpop.eup %1338 }
 0x16b   :  { %v1341_v34 = vpop.eup %1340  ;;  %v446_v36 = vadd.f32 1.0, %v1339_v33  ;;  %v494_v33 = vld [vmem:[#allocation3 + $0x28] sm:$0x30] }
 0x16c   :  { %v447_v38 = vadd.f32 1.0, %v1341_v34 }
 0x16d   :  { %1342 = vrcp.f32 %v446_v36  ;;  %v459_v44 = vand.u32 2147483648, %v446_v36  ;;  %v457_v48 = vand.u32 2147483647, %v446_v36  ;;  %vm453_vm10 = vweird.f32 %v446_v36 }
 0x16e   :  { %1344 = vrcp.f32 %v447_v38  ;;  %v474_v4 = vand.u32 2147483648, %v447_v38  ;;  %vm468_vm14 = vweird.f32 %v447_v38  ;;  %v472_v6 = vand.u32 2147483647, %v447_v38 }
 0x16f   :  { %v460_v51 = vor.u32 1.1754944e-38, %v459_v44  ;;  %vm458_vm12 = vcmp.eq.f32.partialorder %v457_v48, 8.507059e+37 }
 0x170   :  { %v475_v13 = vor.u32 1.1754944e-38, %v474_v4  ;;  %vm473_vm0 = vcmp.eq.f32.partialorder %v472_v6, 8.507059e+37 }
 0x173   :  { %v1343_v39 = vpop.eup %1342 }
 0x174   :  { %v449_v41 = vmul.f32 %v1343_v39, %v446_v36  ;;  %v1345_v45 = vpop.eup %1344  ;;  %vm454_vm9 = vweird.f32 %v1343_v39 }
 0x175   :  { %vm455_vm11 = vmor %vm453_vm10, %vm454_vm9  ;;  %v464_v53 = vmul.f32 %v1345_v45, %v447_v38  ;;  %vm469_vm13 = vweird.f32 %v1345_v45 }
 0x176   :  { %v450_v42 = vsub.f32 1.0, %v449_v41  ;;  %vm470_vm15 = vmor %vm468_vm14, %vm469_vm13 }
 0x177   :  { %v465_v59 = vsub.f32 1.0, %v464_v53 }
 0x178   :  { %v451_v47 = vmul.f32 %v1343_v39, %v450_v42  ;;  %v495_v42 = vld [vmem:[#allocation3 + $0x10] sm:$0x30] }
 0x179   :  { %v466_v63 = vmul.f32 %v1345_v45, %v465_v59 }
 0x17a   :  { %v452_v50 = vadd.f32 %v1343_v39, %v451_v47 }
 0x17b   :  { %v467_v2 = vadd.f32 %v1345_v45, %v466_v63 }
 0x17c   :  { %v456_v55 = vsel %vm455_vm11, %v1343_v39, %v452_v50 }
 0x17d   :  { %v461_v56 = vsel %vm458_vm12, %v460_v51, %v456_v55  ;;  %v471_v9 = vsel %vm470_vm15, %v1345_v45, %v467_v2 }
 0x17e   :  { %v482_v57 = vmul.f32 %v480_v54, %v461_v56  ;;  %v476_v20 = vsel %vm473_vm0, %v475_v13, %v471_v9 }
 0x180   :  { %v483_v61 = vadd.f32 %v482_v57, %v391_v60 }
 0x182   :  { %1346 = vtanh.f32 %v483_v61 }
 0x188   :  { %v1347_v17 = vpop.eup %1346 }
 0x189   :  { %v486_v7 = vrot.slane %v1347_v17, 2 }
 0x18b   :  { %v488_v12 = vsub.f32 %v1808_v1, %v486_v7 }
 0x18d   :  { %v490_v14 = vrot.slane %v488_v12, 6 }
 0x18f   :  { %v492_v23 = vmul.f32 %v490_v14, %v476_v20  ;;  %v496_v20 = vld [vmem:[#allocation3 + $0x8] sm:$0x30] }
 0x191   :  { %v1838_v24 = vadd.f32 %v1347_v17, %v492_v23 }
 0x193   :  { %v497_v21 = vpack.c.bf16 %v1838_v24, %v1838_v24 }
 0x195   :  { %v499_v26 = vrot.slane %v497_v21, 1 }
 0x197   :  { %509 = vmatmul.bf16.vlgmr.msra.gmra.mxu1 %v499_v26  ;;  %522 = vmatmul.bf16.vlgmr.msra.gmra.mxu2 %v499_v26 }
 0x198   :  { %535 = vmatmul.bf16.vlgmr.msra.gmra.mxu3 %v499_v26  ;;  %743 = vmatpush.bf16.msra.mxu1 %v1577_v40 }
 0x199   :  { %813 = vmatpush.bf16.msra.mxu2 %v1476_v3  ;;  %826 = vmatpush.bf16.msra.mxu3 %v1508_v16 }
 0x19c   :  { %744 = vmatpush.bf16.msra.mxu1 %v1610_v52 }
 0x19d   :  { %814 = vmatpush.bf16.msra.mxu2 %v1497_v11  ;;  %827 = vmatpush.bf16.msra.mxu3 %v1537_v25 }
 0x1a0   :  { %745 = vmatpush.bf16.msra.mxu1 %v1642_v0 }
 0x1a1   :  { %815 = vmatpush.bf16.msra.mxu2 %v1517_v19  ;;  %828 = vmatpush.bf16.msra.mxu3 %v1569_v37 }
 0x1a4   :  { %746 = vmatpush.bf16.msra.mxu1 %v1669_v10 }
 0x1a5   :  { %816 = vmatpush.bf16.msra.mxu2 %v1552_v31  ;;  %829 = vmatpush.bf16.msra.mxu3 %v1601_v49 }
 0x1a8   :  { %747 = vmatpush.bf16.msra.mxu1 %v1695_v22 }
 0x1a9   :  { %817 = vmatpush.bf16.msra.mxu2 %v1586_v43  ;;  %830 = vmatpush.bf16.msra.mxu3 %v1636_v62 }
 0x1ac   :  { %748 = vmatpush.bf16.msra.mxu1 %v1715_v28 }
 0x1ad   :  { %818 = vmatpush.bf16.msra.mxu2 %v1625_v58  ;;  %831 = vmatpush.bf16.msra.mxu3 %v1663_v8 }
 0x1b0   :  { %749 = vmatpush.bf16.msra.mxu1 %v1727_v32 }
 0x1b1   :  { %819 = vmatpush.bf16.msra.mxu2 %v1654_v5  ;;  %832 = vmatpush.bf16.msra.mxu3 %v1689_v18 }
 0x1b4   :  { %750 = vmatpush.bf16.msra.mxu1 %v1739_v35 }
 0x1b5   :  { %820 = vmatpush.bf16.msra.mxu2 %v1682_v15  ;;  %833 = vmatpush.bf16.msra.mxu3 %v1712_v27 }
 0x214   :  { %v510_v1 = vpop.f32.mrf.mxu1 }
 0x215   :  { %v542_v30 = vrot.slane %v510_v1, 4 }
 0x217   :  { %v546_v34 = vadd.f32 %v542_v30, %v494_v33 }
 0x219   :  { %v1282_v36 = vmul.f32 -1.442695, %v546_v34 }
 0x21a   :  { %v523_v38 = vpop.f32.mrf.mxu2 }
 0x21b   :  { %1348 = vpow2.f32 %v1282_v36  ;;  %v543_v39 = vrot.slane %v523_v38, 4  ;;  %v536_v41 = vpop.f32.mrf.mxu3 }
 0x21c   :  { %v512_v44 = vpop.f32.mrf.mxu1  ;;  %v586_v63 = vadd.f32 %v1804_v29, %v536_v41 }
 0x21d   :  { %v547_v45 = vadd.f32 %v543_v39, %v495_v42 }
 0x21e   :  { %v588_v9 = vrot.slane %v586_v63, 4 }
 0x21f   :  { %v1283_v46 = vmul.f32 -1.442695, %v547_v45 }
 0x221   :  { %v1349_v47 = vpop.eup %1348  ;;  %1350 = vpow2.f32 %v1283_v46 }
 0x222   :  { %v554_v48 = vadd.f32 1.0, %v1349_v47  ;;  %v525_v50 = vpop.f32.mrf.mxu2 }
 0x223   :  { %v538_v51 = vpop.f32.mrf.mxu3 }
 0x224   :  { %1352 = vrcp.f32 %v554_v48  ;;  %v567_v59 = vand.u32 2147483648, %v554_v48  ;;  %v565_v61 = vand.u32 2147483647, %v554_v48  ;;  %vm561_vm2 = vweird.f32 %v554_v48 }
 0x226   :  { %v568_v6 = vor.u32 1.1754944e-38, %v567_v59  ;;  %vm566_vm4 = vcmp.eq.f32.partialorder %v565_v61, 8.507059e+37 }
 0x227   :  { %v1351_v53 = vpop.eup %1350 }
 0x228   :  { %v555_v54 = vadd.f32 1.0, %v1351_v53  ;;  %v602_v53 = vld [vmem:[#allocation3 + $0x28] sm:$0xc0] }
 0x22a   :  { %v1353_v55 = vpop.eup %1352  ;;  %1354 = vrcp.f32 %v555_v54  ;;  %v582_v30 = vand.u32 2147483648, %v555_v54  ;;  %vm576_vm6 = vweird.f32 %v555_v54  ;;  %v580_v34 = vand.u32 2147483647, %v555_v54 }
 0x22b   :  { %v557_v56 = vmul.f32 %v1353_v55, %v554_v48  ;;  %vm562_vm1 = vweird.f32 %v1353_v55 }
 0x22c   :  { %vm563_vm3 = vmor %vm561_vm2, %vm562_vm1  ;;  %v583_v39 = vor.u32 1.1754944e-38, %v582_v30  ;;  %vm581_vm8 = vcmp.eq.f32.partialorder %v580_v34, 8.507059e+37 }
 0x22d   :  { %v558_v57 = vsub.f32 1.0, %v557_v56 }
 0x22f   :  { %v559_v60 = vmul.f32 %v1353_v55, %v558_v57 }
 0x230   :  { %v1355_v2 = vpop.eup %1354 }
 0x231   :  { %v560_v17 = vadd.f32 %v1353_v55, %v559_v60  ;;  %v572_v4 = vmul.f32 %v1355_v2, %v555_v54  ;;  %vm577_vm5 = vweird.f32 %v1355_v2  ;;  %v603_v54 = vld [vmem:[#allocation3 + $0x10] sm:$0xc0] }
 0x232   :  { %vm578_vm7 = vmor %vm576_vm6, %vm577_vm5 }
 0x233   :  { %v564_v7 = vsel %vm563_vm3, %v1353_v55, %v560_v17  ;;  %v573_v14 = vsub.f32 1.0, %v572_v4 }
 0x234   :  { %v569_v12 = vsel %vm566_vm4, %v568_v6, %v564_v7 }
 0x235   :  { %v590_v13 = vmul.f32 %v588_v9, %v569_v12  ;;  %v574_v21 = vmul.f32 %v1355_v2, %v573_v14 }
 0x237   :  { %v591_v23 = vadd.f32 %v590_v13, %v496_v20  ;;  %v575_v26 = vadd.f32 %v1355_v2, %v574_v21 }
 0x239   :  { %1356 = vtanh.f32 %v591_v23  ;;  %v579_v36 = vsel %vm578_vm7, %v1355_v2, %v575_v26 }
 0x23a   :  { %v584_v42 = vsel %vm581_vm8, %v583_v39, %v579_v36 }
 0x23f   :  { %v1357_v1 = vpop.eup %1356 }
 0x240   :  { %v594_v33 = vrot.slane %v1357_v1, 2 }
 0x242   :  { %v596_v38 = vsub.f32 %v1838_v24, %v594_v33 }
 0x244   :  { %v598_v41 = vrot.slane %v596_v38, 6 }
 0x246   :  { %v600_v44 = vmul.f32 %v598_v41, %v584_v42  ;;  %v604_v42 = vld [vmem:[#allocation3 + $0x8] sm:$0xc0] }
 0x248   :  { %v1868_v45 = vadd.f32 %v1357_v1, %v600_v44 }
 0x24a   :  { %v605_v46 = vpack.c.bf16 %v1868_v45, %v1868_v45 }
 0x24c   :  { %v607_v47 = vrot.slane %v605_v46, 2 }
 0x24e   :  { %617 = vmatmul.bf16.vlgmr.msrb.gmra.mxu0 %v607_v47  ;;  %630 = vmatmul.bf16.vlgmr.msrb.gmra.mxu1 %v607_v47 }
 0x24f   :  { %643 = vmatmul.bf16.vlgmr.msrb.gmra.mxu2 %v607_v47  ;;  %839 = vmatpush.bf16.msrb.mxu0 %v1577_v40 }
 0x250   :  { %921 = vmatpush.bf16.msrb.mxu1 %v1476_v3  ;;  %934 = vmatpush.bf16.msrb.mxu2 %v1508_v16 }
 0x253   :  { %840 = vmatpush.bf16.msrb.mxu0 %v1610_v52 }
 0x254   :  { %922 = vmatpush.bf16.msrb.mxu1 %v1497_v11  ;;  %935 = vmatpush.bf16.msrb.mxu2 %v1537_v25 }
 0x257   :  { %841 = vmatpush.bf16.msrb.mxu0 %v1642_v0 }
 0x258   :  { %923 = vmatpush.bf16.msrb.mxu1 %v1517_v19  ;;  %936 = vmatpush.bf16.msrb.mxu2 %v1569_v37 }
 0x25b   :  { %842 = vmatpush.bf16.msrb.mxu0 %v1669_v10 }
 0x25c   :  { %924 = vmatpush.bf16.msrb.mxu1 %v1552_v31  ;;  %937 = vmatpush.bf16.msrb.mxu2 %v1601_v49 }
 0x25f   :  { %843 = vmatpush.bf16.msrb.mxu0 %v1695_v22 }
 0x260   :  { %925 = vmatpush.bf16.msrb.mxu1 %v1586_v43  ;;  %938 = vmatpush.bf16.msrb.mxu2 %v1636_v62 }
 0x263   :  { %844 = vmatpush.bf16.msrb.mxu0 %v1715_v28 }
 0x264   :  { %926 = vmatpush.bf16.msrb.mxu1 %v1625_v58  ;;  %939 = vmatpush.bf16.msrb.mxu2 %v1663_v8 }
 0x267   :  { %845 = vmatpush.bf16.msrb.mxu0 %v1727_v32 }
 0x268   :  { %927 = vmatpush.bf16.msrb.mxu1 %v1654_v5  ;;  %940 = vmatpush.bf16.msrb.mxu2 %v1689_v18 }
 0x26b   :  { %846 = vmatpush.bf16.msrb.mxu0 %v1739_v35 }
 0x26c   :  { %928 = vmatpush.bf16.msrb.mxu1 %v1682_v15  ;;  %941 = vmatpush.bf16.msrb.mxu2 %v1712_v27 }
 0x2cb   :  { %v618_v24 = vpop.f32.mrf.mxu0  ;;  %v631_v48 = vpop.f32.mrf.mxu1 }
 0x2cc   :  { %v650_v50 = vrot.slane %v618_v24, 2  ;;  %v651_v51 = vrot.slane %v631_v48, 2 }
 0x2ce   :  { %v654_v55 = vadd.f32 %v650_v50, %v602_v53  ;;  %v655_v56 = vadd.f32 %v651_v51, %v603_v54 }
 0x2d0   :  { %v1284_v57 = vmul.f32 -1.442695, %v654_v55  ;;  %v1285_v59 = vmul.f32 -1.442695, %v655_v56 }
 0x2d2   :  { %1358 = vpow2.f32 %v1284_v57  ;;  %v644_v60 = vpop.f32.mrf.mxu2 }
 0x2d3   :  { %1360 = vpow2.f32 %v1285_v59  ;;  %v620_v61 = vpop.f32.mrf.mxu0  ;;  %v633_v63 = vpop.f32.mrf.mxu1  ;;  %v694_v26 = vadd.f32 %v1804_v29, %v644_v60 }
 0x2d5   :  { %v696_v36 = vrot.slane %v694_v26, 2 }
 0x2d8   :  { %v1359_v2 = vpop.eup %1358 }
 0x2d9   :  { %v1361_v17 = vpop.eup %1360  ;;  %v662_v4 = vadd.f32 1.0, %v1359_v2 }
 0x2da   :  { %v646_v6 = vpop.f32.mrf.mxu2  ;;  %v663_v7 = vadd.f32 1.0, %v1361_v17 }
 0x2db   :  { %1362 = vrcp.f32 %v662_v4  ;;  %v675_v14 = vand.u32 2147483648, %v662_v4  ;;  %v673_v21 = vand.u32 2147483647, %v662_v4  ;;  %vm669_vm10 = vweird.f32 %v662_v4 }
 0x2dc   :  { %1364 = vrcp.f32 %v663_v7  ;;  %v690_v48 = vand.u32 2147483648, %v663_v7  ;;  %vm684_vm14 = vweird.f32 %v663_v7  ;;  %v688_v51 = vand.u32 2147483647, %v663_v7 }
 0x2dd   :  { %v676_v33 = vor.u32 1.1754944e-38, %v675_v14  ;;  %vm674_vm12 = vcmp.eq.f32.partialorder %v673_v21, 8.507059e+37 }
 0x2de   :  { %v691_v55 = vor.u32 1.1754944e-38, %v690_v48  ;;  %vm689_vm0 = vcmp.eq.f32.partialorder %v688_v51, 8.507059e+37 }
 0x2e1   :  { %v1363_v9 = vpop.eup %1362 }
 0x2e2   :  { %v665_v12 = vmul.f32 %v1363_v9, %v662_v4  ;;  %v1365_v20 = vpop.eup %1364  ;;  %vm670_vm9 = vweird.f32 %v1363_v9 }
 0x2e3   :  { %v680_v30 = vmul.f32 %v1365_v20, %v663_v7  ;;  %vm671_vm11 = vmor %vm669_vm10, %vm670_vm9  ;;  %vm685_vm13 = vweird.f32 %v1365_v20 }
 0x2e4   :  { %v666_v13 = vsub.f32 1.0, %v665_v12  ;;  %vm686_vm15 = vmor %vm684_vm14, %vm685_vm13 }
 0x2e5   :  { %v681_v41 = vsub.f32 1.0, %v680_v30  ;;  %v712_v30 = vld [vmem:[#allocation3 + $0x20] sm:$0x3] }
 0x2e6   :  { %v667_v23 = vmul.f32 %v1363_v9, %v666_v13 }
 0x2e7   :  { %v682_v46 = vmul.f32 %v1365_v20, %v681_v41 }
 0x2e8   :  { %v668_v1 = vadd.f32 %v1363_v9, %v667_v23 }
 0x2e9   :  { %v683_v47 = vadd.f32 %v1365_v20, %v682_v46 }
 0x2ea   :  { %v672_v34 = vsel %vm671_vm11, %v1363_v9, %v668_v1 }
 0x2eb   :  { %v677_v38 = vsel %vm674_vm12, %v676_v33, %v672_v34  ;;  %v687_v53 = vsel %vm686_vm15, %v1365_v20, %v683_v47 }
 0x2ec   :  { %v698_v39 = vmul.f32 %v696_v36, %v677_v38  ;;  %v692_v57 = vsel %vm689_vm0, %v691_v55, %v687_v53 }
 0x2ee   :  { %v699_v44 = vadd.f32 %v698_v39, %v604_v42 }
 0x2f0   :  { %1366 = vtanh.f32 %v699_v44 }
 0x2f6   :  { %v1367_v24 = vpop.eup %1366 }
 0x2f7   :  { %v702_v50 = vrot.slane %v1367_v24, 2 }
 0x2f9   :  { %v704_v54 = vsub.f32 %v1868_v45, %v702_v50 }
 0x2fb   :  { %v706_v56 = vrot.slane %v704_v54, 6 }
 0x2fd   :  { %v708_v59 = vmul.f32 %v706_v56, %v692_v57 }
 0x2ff   :  { %v1898_v60 = vadd.f32 %v1367_v24, %v708_v59 }
 0x301   :  { %v713_v61 = vpack.c.bf16 %v1898_v60, %v1898_v60 }
 0x303   :  { %v715_v63 = vrot.slane %v713_v61, 3 }
 0x305   :  { %725 = vmatmul.bf16.vlgmr.msrb.gmra.mxu3 %v715_v63  ;;  %738 = vmatmul.bf16.vlgmr.msra.gmra.mxu0 %v715_v63 }
 0x306   :  { %751 = vmatmul.bf16.vlgmr.msra.gmra.mxu1 %v715_v63  ;;  %947 = vmatpush.bf16.msrb.mxu3 %v1577_v40 }
 0x307   :  { %1029 = vmatpush.bf16.msra.mxu0 %v1476_v3  ;;  %1042 = vmatpush.bf16.msra.mxu1 %v1508_v16  ;;  %v711_v16 = vld [vmem:[#allocation3 + $0x18] sm:$0x3] }
 0x30a   :  { %948 = vmatpush.bf16.msrb.mxu3 %v1610_v52 }
 0x30b   :  { %1030 = vmatpush.bf16.msra.mxu0 %v1497_v11  ;;  %1043 = vmatpush.bf16.msra.mxu1 %v1537_v25  ;;  %v710_v25 = vld [vmem:[#allocation3] sm:$0x3] }
 0x30e   :  { %949 = vmatpush.bf16.msrb.mxu3 %v1642_v0 }
 0x30f   :  { %1031 = vmatpush.bf16.msra.mxu0 %v1517_v19  ;;  %1044 = vmatpush.bf16.msra.mxu1 %v1569_v37 }
 0x312   :  { %950 = vmatpush.bf16.msrb.mxu3 %v1669_v10 }
 0x313   :  { %1032 = vmatpush.bf16.msra.mxu0 %v1552_v31  ;;  %1045 = vmatpush.bf16.msra.mxu1 %v1601_v49 }
 0x316   :  { %951 = vmatpush.bf16.msrb.mxu3 %v1695_v22 }
 0x317   :  { %1033 = vmatpush.bf16.msra.mxu0 %v1586_v43  ;;  %1046 = vmatpush.bf16.msra.mxu1 %v1636_v62 }
 0x31a   :  { %952 = vmatpush.bf16.msrb.mxu3 %v1715_v28 }
 0x31b   :  { %1034 = vmatpush.bf16.msra.mxu0 %v1625_v58  ;;  %1047 = vmatpush.bf16.msra.mxu1 %v1663_v8 }
 0x31e   :  { %953 = vmatpush.bf16.msrb.mxu3 %v1727_v32 }
 0x31f   :  { %1035 = vmatpush.bf16.msra.mxu0 %v1654_v5  ;;  %1048 = vmatpush.bf16.msra.mxu1 %v1689_v18 }
 0x322   :  { %954 = vmatpush.bf16.msrb.mxu3 %v1739_v35 }
 0x323   :  { %1036 = vmatpush.bf16.msra.mxu0 %v1682_v15  ;;  %1049 = vmatpush.bf16.msra.mxu1 %v1712_v27 }
 0x382   :  { %v739_v3 = vpop.f32.mrf.mxu0 }
 0x383   :  { %v752_v11 = vpop.f32.mrf.mxu1  ;;  %v757_v19 = vadd.f32 %v739_v3, %v711_v16 }
 0x384   :  { %v796_v20 = vadd.f32 %v1804_v29, %v752_v11 }
 0x385   :  { %v1287_v43 = vmul.f32 -1.442695, %v757_v19 }
 0x388   :  { %v726_v31 = vpop.f32.mrf.mxu3 }
 0x389   :  { %v756_v37 = vadd.f32 %v726_v31, %v710_v25 }
 0x38a   :  { %v741_v49 = vpop.f32.mrf.mxu0 }
 0x38b   :  { %v1286_v58 = vmul.f32 -1.442695, %v756_v37  ;;  %v754_v62 = vpop.f32.mrf.mxu1 }
 0x38d   :  { %1368 = vpow2.f32 %v1286_v58 }
 0x38e   :  { %1370 = vpow2.f32 %v1287_v43 }
 0x390   :  { %v728_v5 = vpop.f32.mrf.mxu3 }
 0x393   :  { %v1369_v8 = vpop.eup %1368 }
 0x394   :  { %v1371_v18 = vpop.eup %1370  ;;  %v764_v45 = vadd.f32 1.0, %v1369_v8 }
 0x395   :  { %v765_v15 = vadd.f32 1.0, %v1371_v18 }
 0x396   :  { %1372 = vrcp.f32 %v764_v45  ;;  %v777_v4 = vand.u32 2147483648, %v764_v45  ;;  %v775_v9 = vand.u32 2147483647, %v764_v45  ;;  %vm771_vm2 = vweird.f32 %v764_v45 }
 0x397   :  { %1374 = vrcp.f32 %v765_v15  ;;  %v792_v39 = vand.u32 2147483648, %v765_v15  ;;  %vm786_vm6 = vweird.f32 %v765_v15  ;;  %v790_v41 = vand.u32 2147483647, %v765_v15 }
 0x398   :  { %v778_v14 = vor.u32 1.1754944e-38, %v777_v4  ;;  %vm776_vm4 = vcmp.eq.f32.partialorder %v775_v9, 8.507059e+37 }
 0x399   :  { %v793_v47 = vor.u32 1.1754944e-38, %v792_v39  ;;  %vm791_vm8 = vcmp.eq.f32.partialorder %v790_v41, 8.507059e+37  ;;  %v914_v41 = vld [vmem:[#allocation3] sm:$0x30] }
 0x39c   :  { %v1373_v27 = vpop.eup %1372 }
 0x39d   :  { %v767_v2 = vmul.f32 %v1373_v27, %v764_v45  ;;  %v1375_v6 = vpop.eup %1374  ;;  %vm772_vm1 = vweird.f32 %v1373_v27 }
 0x39e   :  { %v782_v13 = vmul.f32 %v1375_v6, %v765_v15  ;;  %vm773_vm3 = vmor %vm771_vm2, %vm772_vm1  ;;  %vm787_vm5 = vweird.f32 %v1375_v6 }
 0x39f   :  { %v768_v17 = vsub.f32 1.0, %v767_v2  ;;  %vm788_vm7 = vmor %vm786_vm6, %vm787_vm5 }
 0x3a0   :  { %v783_v1 = vsub.f32 1.0, %v782_v13 }
 0x3a1   :  { %v769_v7 = vmul.f32 %v1373_v27, %v768_v17  ;;  %v811_v17 = vld [vmem:[#allocation3 + $0x20] sm:$0xc] }
 0x3a2   :  { %v784_v34 = vmul.f32 %v1375_v6, %v783_v1 }
 0x3a3   :  { %v770_v12 = vadd.f32 %v1373_v27, %v769_v7 }
 0x3a4   :  { %v785_v36 = vadd.f32 %v1375_v6, %v784_v34 }
 0x3a5   :  { %v774_v23 = vsel %vm773_vm3, %v1373_v27, %v770_v12 }
 0x3a6   :  { %v779_v21 = vsel %vm776_vm4, %v778_v14, %v774_v23  ;;  %v789_v44 = vsel %vm788_vm7, %v1375_v6, %v785_v36 }
 0x3a7   :  { %v797_v26 = vmul.f32 %v796_v20, %v779_v21  ;;  %v794_v48 = vsel %vm791_vm8, %v793_v47, %v789_v44 }
 0x3a9   :  { %v798_v33 = vadd.f32 %v797_v26, %v712_v30 }
 0x3ab   :  { %1376 = vtanh.f32 %v798_v33 }
 0x3b1   :  { %v1377_v38 = vpop.eup %1376 }
 0x3b2   :  { %v801_v42 = vrot.slane %v1377_v38, 2 }
 0x3b4   :  { %v803_v46 = vsub.f32 %v1898_v60, %v801_v42  ;;  %v810_v60 = vld [vmem:[#allocation3 + $0x18] sm:$0xc] }
 0x3b6   :  { %v805_v24 = vrot.slane %v803_v46, 6 }
 0x3b8   :  { %v807_v50 = vmul.f32 %v805_v24, %v794_v48  ;;  %v915_v48 = vld [vmem:[#allocation3 + $0x18] sm:$0x30] }
 0x3ba   :  { %v1928_v51 = vadd.f32 %v1377_v38, %v807_v50 }
 0x3bc   :  { %v812_v53 = vpack.c.bf16 %v1928_v51, %v1928_v51 }
 0x3be   :  { %821 = vmatmul.bf16.vlgmr.msra.gmra.mxu2 %v812_v53  ;;  %834 = vmatmul.bf16.vlgmr.msra.gmra.mxu3 %v812_v53 }
 0x3bf   :  { %847 = vmatmul.bf16.vlgmr.msrb.gmra.mxu0 %v812_v53  ;;  %1055 = vmatpush.bf16.msra.mxu2 %v1577_v40  ;;  %v809_v40 = vld [vmem:[#allocation3] sm:$0xc] }
 0x3c3   :  { %1056 = vmatpush.bf16.msra.mxu2 %v1610_v52 }
 0x3c7   :  { %1057 = vmatpush.bf16.msra.mxu2 %v1642_v0 }
 0x3cb   :  { %1058 = vmatpush.bf16.msra.mxu2 %v1669_v10 }
 0x3cf   :  { %1059 = vmatpush.bf16.msra.mxu2 %v1695_v22 }
 0x3d3   :  { %1060 = vmatpush.bf16.msra.mxu2 %v1715_v28 }
 0x3d7   :  { %1061 = vmatpush.bf16.msra.mxu2 %v1727_v32 }
 0x3db   :  { %1062 = vmatpush.bf16.msra.mxu2 %v1739_v35 }
 0x43c   :  { %v848_v54 = vpop.f32.mrf.mxu0 }
 0x43d   :  { %v898_v43 = vadd.f32 %v1804_v29, %v848_v54 }
 0x43f   :  { %v900_v18 = vrot.slane %v898_v43, 6 }
 0x441   :  { %v822_v55 = vpop.f32.mrf.mxu2  ;;  %v835_v56 = vpop.f32.mrf.mxu3 }
 0x442   :  { %v854_v57 = vrot.slane %v822_v55, 6  ;;  %v855_v59 = vrot.slane %v835_v56, 6 }
 0x444   :  { %v858_v52 = vadd.f32 %v854_v57, %v809_v40  ;;  %v859_v61 = vadd.f32 %v855_v59, %v810_v60  ;;  %v850_v0 = vpop.f32.mrf.mxu0 }
 0x446   :  { %v1288_v63 = vmul.f32 -1.442695, %v858_v52  ;;  %v1289_v10 = vmul.f32 -1.442695, %v859_v61 }
 0x448   :  { %1378 = vpow2.f32 %v1288_v63 }
 0x449   :  { %1380 = vpow2.f32 %v1289_v10  ;;  %v824_v22 = vpop.f32.mrf.mxu2  ;;  %v837_v28 = vpop.f32.mrf.mxu3 }
 0x44e   :  { %v1379_v3 = vpop.eup %1378 }
 0x44f   :  { %v1381_v32 = vpop.eup %1380  ;;  %v866_v11 = vadd.f32 1.0, %v1379_v3 }
 0x450   :  { %v867_v35 = vadd.f32 1.0, %v1381_v32 }
 0x451   :  { %1382 = vrcp.f32 %v866_v11  ;;  %v879_v31 = vand.u32 2147483648, %v866_v11  ;;  %v877_v58 = vand.u32 2147483647, %v866_v11  ;;  %vm873_vm10 = vweird.f32 %v866_v11 }
 0x452   :  { %1384 = vrcp.f32 %v867_v35  ;;  %v894_v12 = vand.u32 2147483648, %v867_v35  ;;  %vm888_vm14 = vweird.f32 %v867_v35  ;;  %v892_v13 = vand.u32 2147483647, %v867_v35 }
 0x453   :  { %v880_v5 = vor.u32 1.1754944e-38, %v879_v31  ;;  %vm878_vm12 = vcmp.eq.f32.partialorder %v877_v58, 8.507059e+37 }
 0x454   :  { %v895_v21 = vor.u32 1.1754944e-38, %v894_v12  ;;  %vm893_vm0 = vcmp.eq.f32.partialorder %v892_v13, 8.507059e+37 }
 0x457   :  { %v1383_v16 = vpop.eup %1382 }
 0x458   :  { %v869_v19 = vmul.f32 %v1383_v16, %v866_v11  ;;  %v1385_v37 = vpop.eup %1384  ;;  %vm874_vm9 = vweird.f32 %v1383_v16 }
 0x459   :  { %vm875_vm11 = vmor %vm873_vm10, %vm874_vm9  ;;  %v884_v8 = vmul.f32 %v1385_v37, %v867_v35  ;;  %vm889_vm13 = vweird.f32 %v1385_v37 }
 0x45a   :  { %v870_v25 = vsub.f32 1.0, %v869_v19  ;;  %vm890_vm15 = vmor %vm888_vm14, %vm889_vm13 }
 0x45b   :  { %v885_v2 = vsub.f32 1.0, %v884_v8 }
 0x45c   :  { %v871_v49 = vmul.f32 %v1383_v16, %v870_v25 }
 0x45d   :  { %v886_v6 = vmul.f32 %v1385_v37, %v885_v2 }
 0x45e   :  { %v872_v62 = vadd.f32 %v1383_v16, %v871_v49 }
 0x45f   :  { %v887_v7 = vadd.f32 %v1385_v37, %v886_v6 }
 0x460   :  { %v876_v45 = vsel %vm875_vm11, %v1383_v16, %v872_v62 }
 0x461   :  { %v881_v15 = vsel %vm878_vm12, %v880_v5, %v876_v45  ;;  %v891_v20 = vsel %vm890_vm15, %v1385_v37, %v887_v7  ;;  %v916_v37 = vld [vmem:[#allocation3 + $0x20] sm:$0x30] }
 0x462   :  { %v902_v27 = vmul.f32 %v900_v18, %v881_v15  ;;  %v896_v1 = vsel %vm893_vm0, %v895_v21, %v891_v20  ;;  %v1022_v20 = vld [vmem:[#allocation3] sm:$0xc0] }
 0x464   :  { %v903_v4 = vadd.f32 %v902_v27, %v811_v17 }
 0x466   :  { %1386 = vtanh.f32 %v903_v4 }
 0x46c   :  { %v1387_v9 = vpop.eup %1386 }
 0x46d   :  { %v906_v14 = vrot.slane %v1387_v9, 2 }
 0x46f   :  { %v908_v23 = vsub.f32 %v1928_v51, %v906_v14 }
 0x471   :  { %v910_v26 = vrot.slane %v908_v23, 6  ;;  %v1023_v23 = vld [vmem:[#allocation3 + $0x18] sm:$0xc0] }
 0x473   :  { %v912_v30 = vmul.f32 %v910_v26, %v896_v1 }
 0x475   :  { %v913_v33 = vadd.f32 %v1387_v9, %v912_v30 }
 0x477   :  { %v917_v34 = vpack.c.bf16 %v913_v33, %v913_v33 }
 0x479   :  { %v919_v36 = vrot.slane %v917_v34, 1 }
 0x47b   :  { %929 = vmatmul.bf16.vlgmr.msrb.gmra.mxu1 %v919_v36  ;;  %942 = vmatmul.bf16.vlgmr.msrb.gmra.mxu2 %v919_v36 }
 0x47c   :  { %955 = vmatmul.bf16.vlgmr.msrb.gmra.mxu3 %v919_v36 }
 0x4f8   :  { %v930_v38 = vpop.f32.mrf.mxu1 }
 0x4f9   :  { %v962_v39 = vrot.slane %v930_v38, 4 }
 0x4fb   :  { %v966_v42 = vadd.f32 %v962_v39, %v914_v41 }
 0x4fd   :  { %v1290_v44 = vmul.f32 -1.442695, %v966_v42 }
 0x4fe   :  { %v943_v46 = vpop.f32.mrf.mxu2 }
 0x4ff   :  { %1388 = vpow2.f32 %v1290_v44  ;;  %v963_v47 = vrot.slane %v943_v46, 4  ;;  %v956_v24 = vpop.f32.mrf.mxu3 }
 0x500   :  { %v932_v50 = vpop.f32.mrf.mxu1  ;;  %v1006_v22 = vadd.f32 %v1804_v29, %v956_v24 }
 0x501   :  { %v967_v51 = vadd.f32 %v963_v47, %v915_v48 }
 0x502   :  { %v1008_v16 = vrot.slane %v1006_v22, 4 }
 0x503   :  { %v1291_v53 = vmul.f32 -1.442695, %v967_v51 }
 0x505   :  { %v1389_v54 = vpop.eup %1388  ;;  %1390 = vpow2.f32 %v1291_v53 }
 0x506   :  { %v974_v55 = vadd.f32 1.0, %v1389_v54  ;;  %v945_v56 = vpop.f32.mrf.mxu2  ;;  %v1408_v54 = vld [vmem:[%s1958_s4] ss:$0 sm:$0xff]  ;;  %s1436_s4 = smov [#allocation4]  }
 0x507   :  { %v958_v57 = vpop.f32.mrf.mxu3  ;;  %s1140_s13 = sshll.u32 %s1436_s4, 4  ;;  %s1141_s13 = int_to_ptr.vmem [resolvable:$true] %s1140_s13 }
 0x508   :  { %1392 = vrcp.f32 %v974_v55  ;;  %v987_v0 = vand.u32 2147483648, %v974_v55  ;;  %v985_v10 = vand.u32 2147483647, %v974_v55  ;;  %vm981_vm2 = vweird.f32 %v974_v55 }
 0x50a   :  { %v988_v11 = vor.u32 1.1754944e-38, %v987_v0  ;;  %vm986_vm4 = vcmp.eq.f32.partialorder %v985_v10, 8.507059e+37 }
 0x50b   :  { %v1391_v59 = vpop.eup %1390 }
 0x50c   :  { %v975_v40 = vadd.f32 1.0, %v1391_v59 }
 0x50e   :  { %v1393_v60 = vpop.eup %1392  ;;  %1394 = vrcp.f32 %v975_v40  ;;  %v1002_v29 = vand.u32 2147483648, %v975_v40  ;;  %vm996_vm6 = vweird.f32 %v975_v40  ;;  %v1000_v8 = vand.u32 2147483647, %v975_v40 }
 0x50f   :  { %v977_v52 = vmul.f32 %v1393_v60, %v974_v55  ;;  %vm982_vm1 = vweird.f32 %v1393_v60 }
 0x510   :  { %vm983_vm3 = vmor %vm981_vm2, %vm982_vm1  ;;  %v1003_v15 = vor.u32 1.1754944e-38, %v1002_v29  ;;  %vm1001_vm8 = vcmp.eq.f32.partialorder %v1000_v8, 8.507059e+37 }
 0x511   :  { %v978_v61 = vsub.f32 1.0, %v977_v52 }
 0x513   :  { %v979_v63 = vmul.f32 %v1393_v60, %v978_v61 }
 0x514   :  { %v1395_v28 = vpop.eup %1394 }
 0x515   :  { %v980_v3 = vadd.f32 %v1393_v60, %v979_v63  ;;  %v992_v32 = vmul.f32 %v1395_v28, %v975_v40  ;;  %vm997_vm5 = vweird.f32 %v1395_v28  ;;  %v1024_v63 = vld [vmem:[#allocation3 + $0x20] sm:$0xc0] }
 0x516   :  { %vm998_vm7 = vmor %vm996_vm6, %vm997_vm5 }
 0x517   :  { %v984_v35 = vsel %vm983_vm3, %v1393_v60, %v980_v3  ;;  %v993_v31 = vsub.f32 1.0, %v992_v32 }
 0x518   :  { %v989_v19 = vsel %vm986_vm4, %v988_v11, %v984_v35 }
 0x519   :  { %v1010_v25 = vmul.f32 %v1008_v16, %v989_v19  ;;  %v994_v49 = vmul.f32 %v1395_v28, %v993_v31 }
 0x51b   :  { %v1011_v43 = vadd.f32 %v1010_v25, %v916_v37  ;;  %v995_v58 = vadd.f32 %v1395_v28, %v994_v49 }
 0x51d   :  { %1396 = vtanh.f32 %v1011_v43  ;;  %v999_v18 = vsel %vm998_vm7, %v1395_v28, %v995_v58 }
 0x51e   :  { %v1004_v2 = vsel %vm1001_vm8, %v1003_v15, %v999_v18 }
 0x523   :  { %v1397_v62 = vpop.eup %1396 }
 0x524   :  { %v1014_v5 = vrot.slane %v1397_v62, 2 }
 0x526   :  { %v1016_v45 = vsub.f32 %v913_v33, %v1014_v5 }
 0x528   :  { %v1018_v27 = vrot.slane %v1016_v45, 6 }
 0x52a   :  { %v1020_v17 = vmul.f32 %v1018_v27, %v1004_v2 }
 0x52c   :  { %v1943_v4 = vadd.f32 %v1397_v62, %v1020_v17 }
 0x52e   :  { %v1025_v6 = vpack.c.bf16 %v1943_v4, %v1943_v4 }
 0x530   :  { %v1027_v7 = vrot.slane %v1025_v6, 2 }
 0x532   :  { %1037 = vmatmul.bf16.vlgmr.msra.gmra.mxu0 %v1027_v7  ;;  %1050 = vmatmul.bf16.vlgmr.msra.gmra.mxu1 %v1027_v7 }
 0x533   :  { %1063 = vmatmul.bf16.vlgmr.msra.gmra.mxu2 %v1027_v7 }
 0x5af   :  { %v1038_v9 = vpop.f32.mrf.mxu0  ;;  %v1051_v12 = vpop.f32.mrf.mxu1 }
 0x5b0   :  { %v1070_v13 = vrot.slane %v1038_v9, 2  ;;  %v1071_v14 = vrot.slane %v1051_v12, 2 }
 0x5b2   :  { %v1074_v21 = vadd.f32 %v1070_v13, %v1022_v20  ;;  %v1075_v26 = vadd.f32 %v1071_v14, %v1023_v23 }
 0x5b4   :  { %v1292_v1 = vmul.f32 -1.442695, %v1074_v21  ;;  %v1293_v30 = vmul.f32 -1.442695, %v1075_v26 }
 0x5b6   :  { %1398 = vpow2.f32 %v1292_v1  ;;  %v1064_v33 = vpop.f32.mrf.mxu2 }
 0x5b7   :  { %1400 = vpow2.f32 %v1293_v30  ;;  %v1040_v34 = vpop.f32.mrf.mxu0  ;;  %v1053_v36 = vpop.f32.mrf.mxu1  ;;  %v1114_v55 = vadd.f32 %v1408_v54, %v1064_v33 }
 0x5b9   :  { %v1116_v60 = vrot.slane %v1114_v55, 2 }
 0x5bc   :  { %v1399_v38 = vpop.eup %1398 }
 0x5bd   :  { %v1401_v39 = vpop.eup %1400  ;;  %v1082_v41 = vadd.f32 1.0, %v1399_v38 }
 0x5be   :  { %v1066_v42 = vpop.f32.mrf.mxu2  ;;  %v1083_v44 = vadd.f32 1.0, %v1401_v39 }
 0x5bf   :  { %1402 = vrcp.f32 %v1082_v41  ;;  %v1095_v48 = vand.u32 2147483648, %v1082_v41  ;;  %v1093_v53 = vand.u32 2147483647, %v1082_v41  ;;  %vm1089_vm10 = vweird.f32 %v1082_v41 }
 0x5c0   :  { %1404 = vrcp.f32 %v1083_v44  ;;  %v1110_v32 = vand.u32 2147483648, %v1083_v44  ;;  %vm1104_vm14 = vweird.f32 %v1083_v44  ;;  %v1108_v11 = vand.u32 2147483647, %v1083_v44 }
 0x5c1   :  { %v1096_v59 = vor.u32 1.1754944e-38, %v1095_v48  ;;  %vm1094_vm12 = vcmp.eq.f32.partialorder %v1093_v53, 8.507059e+37 }
 0x5c2   :  { %v1111_v25 = vor.u32 1.1754944e-38, %v1110_v32  ;;  %vm1109_vm0 = vcmp.eq.f32.partialorder %v1108_v11, 8.507059e+37 }
 0x5c5   :  { %v1403_v46 = vpop.eup %1402 }
 0x5c6   :  { %v1085_v47 = vmul.f32 %v1403_v46, %v1082_v41  ;;  %v1405_v50 = vpop.eup %1404  ;;  %vm1090_vm9 = vweird.f32 %v1403_v46 }
 0x5c7   :  { %v1100_v57 = vmul.f32 %v1405_v50, %v1083_v44  ;;  %vm1091_vm11 = vmor %vm1089_vm10, %vm1090_vm9  ;;  %vm1105_vm13 = vweird.f32 %v1405_v50 }
 0x5c8   :  { %v1086_v24 = vsub.f32 1.0, %v1085_v47  ;;  %vm1106_vm15 = vmor %vm1104_vm14, %vm1105_vm13 }
 0x5c9   :  { %v1101_v0 = vsub.f32 1.0, %v1100_v57 }
 0x5ca   :  { %v1087_v51 = vmul.f32 %v1403_v46, %v1086_v24 }
 0x5cb   :  { %v1102_v22 = vmul.f32 %v1405_v50, %v1101_v0 }
 0x5cc   :  { %v1088_v56 = vadd.f32 %v1403_v46, %v1087_v51 }
 0x5cd   :  { %v1103_v28 = vadd.f32 %v1405_v50, %v1102_v22 }
 0x5ce   :  { %v1092_v40 = vsel %vm1091_vm11, %v1403_v46, %v1088_v56 }
 0x5cf   :  { %v1097_v52 = vsel %vm1094_vm12, %v1096_v59, %v1092_v40  ;;  %v1107_v16 = vsel %vm1106_vm15, %v1405_v50, %v1103_v28 }
 0x5d0   :  { %v1118_v61 = vmul.f32 %v1116_v60, %v1097_v52  ;;  %v1112_v37 = vsel %vm1109_vm0, %v1111_v25, %v1107_v16 }
 0x5d2   :  { %v1119_v10 = vadd.f32 %v1118_v61, %v1024_v63 }
 0x5d4   :  { %1406 = vtanh.f32 %v1119_v10 }
 0x5da   :  { %v1407_v3 = vpop.eup %1406 }
 0x5db   :  { %v1122_v35 = vrot.slane %v1407_v3, 2 }
 0x5dd   :  { %v1124_v19 = vsub.f32 %v1943_v4, %v1122_v35 }
 0x5df   :  { %v1126_v31 = vrot.slane %v1124_v19, 6 }
 0x5e1   :  { %v1128_v43 = vmul.f32 %v1126_v31, %v1112_v37 }
 0x5e3   :  { %v1129_v49 = vadd.f32 %v1407_v3, %v1128_v43 }
 0x5e5   :  { %1130 = vst [vmem:[#allocation2 - $0x6] sm:$0xc0] %v1129_v49 }
 0x5e6   :  { %1134 = vst [vmem:[#allocation4 - $0x6] sm:$0xc0] %v1129_v49 }
 0x5e7   :  { %1145 = dma.vmem_to_hbm [thread:$0]  %s1141_s13, 32, %s1143_s16, [#allocation5]  }
 0x5e8   :  { %1433 = dma.done.wait [#allocation5], 32  }
 0x5e9   :  { %1434 = vsyncadd [#allocation5], 4294967264 }
 0x5ea   :  { %1150 = vsyncpa [#allocation5], 1 }

</bundles_post_ra>
